<compile_context>
chip_gen: v6e
topology: v6e:2x2x1
jax: 0.10.0
libtpu: 0.0.40
codegen_flags: <defaults>
</compile_context>

<pallas_src>
import jax
import jax.numpy as jnp
from jax import lax
from jax.experimental import pallas as pl
from jax.experimental.pallas import tpu as pltpu


def _round_up(x, m):
    return (x + m - 1) // m * m


# --------------------------- static layer plan ---------------------------

def _make_plan(n_downsample, input_dim, dim, H, W):
    specs = [(input_dim, dim, 7, 1, 3)]
    d = dim
    for _ in range(2):
        specs.append((d, 2 * d, 4, 2, 1))
        d *= 2
    for _ in range(n_downsample - 2):
        specs.append((d, d, 4, 2, 1))

    plan = []
    h, w = H, W
    for li, (cin, cout, ks, st, pd) in enumerate(specs):
        oh = (h + 2 * pd - ks) // st + 1
        ow = (w + 2 * pd - ks) // st + 1
        if li == 0:
            seg = _round_up(w * cin, 128)        # zero-padded K segment (7x7 layer)
        else:
            assert h % 2 == 0, "paired-row packing needs an even input height"
            seg = w * cin                        # == previous layer's GEMM row width
        plan.append(dict(cin=cin, cout=cout, ksize=ks, stride=st, pad=pd,
                         ih=h, iw=w, oh=oh, ow=ow, seg=seg, out_w=ow * cout))
        h, w = oh, ow
    return plan, d


# --------------------- weight packing (wrapper side) ----------------------

def _build_row_gemm_weight(w_oihw, in_width, pad, stride, out_width, seg):
    """B[kh*seg + w*Ci + ci, ow*Co + co] = sum_{kw: reflect(stride*ow+kw)==w} W[co,ci,kh,kw]."""
    Co, Ci, KH, KW = w_oihw.shape
    Wp = in_width + 2 * pad
    col_map = jnp.array([pad - i for i in range(pad)]
                        + list(range(in_width))
                        + [in_width - 2 - i for i in range(pad)], dtype=jnp.int32)
    wt = jnp.transpose(w_oihw, (2, 3, 1, 0))                 # (KH, KW, Ci, Co)
    wcol = jnp.arange(Wp)[:, None]
    ocol = jnp.arange(out_width)[None, :]
    tap = wcol - stride * ocol                               # (Wp, OW)
    valid = (tap >= 0) & (tap < KW)
    tap_c = jnp.clip(tap, 0, KW - 1)
    b_pad = wt[:, tap_c]                                     # (KH, Wp, OW, Ci, Co)
    b_pad = jnp.where(valid[None, :, :, None, None], b_pad, 0.0)
    b = jnp.zeros((KH, in_width, out_width, Ci, Co), w_oihw.dtype)
    b = b.at[:, col_map].add(b_pad)                          # fold reflect cols back
    b = jnp.transpose(b, (0, 1, 3, 2, 4)).reshape(KH, in_width * Ci, out_width * Co)
    if in_width * Ci < seg:
        b = jnp.pad(b, ((0, 0), (0, seg - in_width * Ci), (0, 0)))
    return b.reshape(KH * seg, out_width * Co)


def pack_params(plan, convs, w_final, b_final, style_dim, style_pad):
    packed = []
    for cfg, (w, b) in zip(plan, convs):
        B = _build_row_gemm_weight(w, cfg['iw'], cfg['pad'], cfg['stride'],
                                   cfg['ow'], cfg['seg']).astype(jnp.bfloat16)
        bias = jnp.tile(b, cfg['ow'])[None, :].astype(jnp.float32)   # (1, ow*cout)
        packed.append((B, bias))
    last = plan[-1]
    wf2d = w_final.reshape(style_dim, last['cout'])                   # (S, C)
    wf_exp = jnp.tile(wf2d.T, (last['ow'], 1)).astype(jnp.float32)    # (ow*C, S)
    wf_exp = jnp.pad(wf_exp, ((0, 0), (0, style_pad - style_dim)))    # lane-dense out
    bf = jnp.pad(b_final, (0, style_pad - style_dim))[None, :].astype(jnp.float32)
    return packed, wf_exp, bf


# ------------------------ fused Pallas forward pass ------------------------

def make_forward(plan, style_dim, N, style_pad=128):
    nconv = len(plan)
    first = plan[0]
    hp0 = first['ih'] + 2 * first['pad']          # row-padded input height
    last = plan[-1]

    def kernel(*refs):
        a1_ref = refs[0]                          # (1, hp0, seg0) bf16 row-padded input
        wrefs = refs[1:1 + 2 * nconv]             # (B_l, bias_l) pairs
        wf_ref = refs[1 + 2 * nconv]              # (out_w_last, style_pad)
        bf_ref = refs[2 + 2 * nconv]              # (1, style_pad)
        o_ref = refs[3 + 2 * nconv]               # (1, 1, style_pad)
        scratch = refs[4 + 2 * nconv:]

        h = None
        si = 0
        for l, cfg in enumerate(plan):
            b_ref, bias_ref = wrefs[2 * l], wrefs[2 * l + 1]
            seg, ks, oh = cfg['seg'], cfg['ksize'], cfg['oh']
            if l == 0:
                p_ref = scratch[si]; si += 1      # bf16 patch scratch
                # stride-1 7x7: each kh tap is a contiguous row window of the input
                for kh in range(ks):
                    p_ref[:, kh * seg:(kh + 1) * seg] = a1_ref[0, kh:kh + oh, :]
                p = p_ref[...]
            else:
                a_ref, p_ref = scratch[si], scratch[si + 1]; si += 2
                prev_oh = plan[l - 1]['oh']
                # scatter previous layer's rows (+ reflect row padding) into the
                # pair-packed scratch: row g holds padded rows (2g, 2g+1) side by side
                rho = [1] + list(range(prev_oh)) + [prev_oh - 2]
                for hh, r in enumerate(rho):
                    c0 = (hh % 2) * seg
                    a_ref[hh // 2:hh // 2 + 1, c0:c0 + seg] = h[r:r + 1, :]
                # stride-2 4x4: each kh tap is a contiguous row block of one half
                for kh in range(ks):
                    g0, half = kh // 2, (kh % 2) * seg
                    p_ref[:, kh * seg:(kh + 1) * seg] = a_ref[g0:g0 + oh, half:half + seg]
                p = p_ref[...].astype(jnp.bfloat16)
            # lane-dense GEMM, bf16 inputs, f32 accumulate, f32 bias+ReLU epilogue
            acc = jnp.dot(p, b_ref[...], preferred_element_type=jnp.float32)
            h = jnp.maximum(acc + bias_ref[...], 0.0)

        # fused AdaptiveAvgPool2d(1) + final 1x1 conv:
        # rows sum over oh, the ow-sum is folded into the tiled wf_exp weight.
        s = jnp.sum(h, axis=0, keepdims=True) * (1.0 / float(last['oh'] * last['ow']))
        out = jnp.dot(s, wf_ref[...], preferred_element_type=jnp.float32) + bf_ref[...]
        o_ref[0, :, :] = out                      # lane-dense (1, style_pad) store

    # ---- specs ----
    in_specs = [pl.BlockSpec((1, hp0, first['seg']), lambda n: (n, 0, 0))]
    for cfg in plan:
        kdim = cfg['ksize'] * cfg['seg']
        in_specs.append(pl.BlockSpec((kdim, cfg['out_w']), lambda n: (0, 0)))
        in_specs.append(pl.BlockSpec((1, cfg['out_w']), lambda n: (0, 0)))
    in_specs.append(pl.BlockSpec((last['out_w'], style_pad), lambda n: (0, 0)))
    in_specs.append(pl.BlockSpec((1, style_pad), lambda n: (0, 0)))
    out_specs = pl.BlockSpec((1, 1, style_pad), lambda n: (n, 0, 0))

    scratch_shapes = []
    for l, cfg in enumerate(plan):
        if l > 0:
            prev = plan[l - 1]
            scratch_shapes.append(
                pltpu.VMEM(((prev['oh'] + 2) // 2, 2 * cfg['seg']), jnp.float32))
        p_dtype = jnp.bfloat16 if l == 0 else jnp.float32
        scratch_shapes.append(
            pltpu.VMEM((cfg['oh'], cfg['ksize'] * cfg['seg']), p_dtype))

    flops = 2 * N * sum(c['oh'] * c['ksize'] * c['seg'] * c['out_w'] for c in plan)
    flops += 2 * N * last['out_w'] * style_pad
    bytes_accessed = (N * hp0 * first['seg'] * 2
                      + sum(c['ksize'] * c['seg'] * c['out_w'] * 2 + c['out_w'] * 4
                            for c in plan)
                      + last['out_w'] * style_pad * 4 + style_pad * 4
                      + N * style_pad * 4)

    grid_spec = pltpu.PrefetchScalarGridSpec(
        num_scalar_prefetch=0, grid=(N,),
        in_specs=in_specs, out_specs=out_specs, scratch_shapes=scratch_shapes)

    call = pl.pallas_call(
        kernel,
        out_shape=jax.ShapeDtypeStruct((N, 1, style_pad), jnp.float32),
        grid_spec=grid_spec,
        compiler_params=pltpu.CompilerParams(dimension_semantics=("parallel",)),
        cost_estimate=pl.CostEstimate(flops=int(flops), transcendentals=0,
                                      bytes_accessed=int(bytes_accessed)),
    )

    def forward(x_nchw, packed, wf_exp, bf):
        x = jnp.transpose(x_nchw, (0, 2, 3, 1))                          # NHWC
        xp = jnp.pad(x, ((0, 0), (first['pad'], first['pad']), (0, 0), (0, 0)),
                     mode='reflect')                                     # row pad only
        a1 = xp.reshape(N, hp0, first['iw'] * first['cin'])
        extra = first['seg'] - first['iw'] * first['cin']
        if extra > 0:
            a1 = jnp.pad(a1, ((0, 0), (0, 0), (0, extra)))
        a1 = a1.astype(jnp.bfloat16)                                     # bf16 HBM read
        args = [a1]
        for (B, bias) in packed:
            args += [B, bias]
        args += [wf_exp, bf]
        out = call(*args)                                                # (N, 1, Sp)
        return out[:, 0, :style_dim].reshape(N, style_dim, 1, 1)

    return forward


# ------------------------------ f32 reference ------------------------------

def _reference_forward(x_nchw, convs, w_final, b_final, plan, style_dim):
    x = x_nchw
    for cfg, (w, b) in zip(plan, convs):
        p = cfg['pad']
        xp = jnp.pad(x, ((0, 0), (0, 0), (p, p), (p, p)), mode='reflect')
        x = lax.conv_general_dilated(xp, w, (cfg['stride'], cfg['stride']), 'VALID',
                                     dimension_numbers=('NCHW', 'OIHW', 'NCHW'))
        x = jnp.maximum(x + b[None, :, None, None], 0.0)
    pooled = jnp.mean(x, axis=(2, 3))                                    # (N, C)
    wf2d = w_final.reshape(style_dim, w_final.shape[1])
    out = pooled @ wf2d.T + b_final[None, :]
    return out[:, :, None, None]


# ---------------------------------- main -----------------------------------

if __name__ == "__main__":
    # StyleEncoder(2, 3, 8, 8, norm='none', activ='relu', pad_type='reflect')
    n_downsample, input_dim, dim, style_dim = 2, 3, 8, 8
    N, H, W = 2, 16, 16
    style_pad = 128                                   # lane-dense output width

    key = jax.random.PRNGKey(0)
    kx, kp = jax.random.split(key)
    x = jax.random.normal(kx, (N, input_dim, H, W), jnp.float32)         # NCHW

    plan, out_dim = _make_plan(n_downsample, input_dim, dim, H, W)

    keys = jax.random.split(kp, len(plan) + 1)
    convs = []
    for k, cfg in zip(keys[:-1], plan):
        kw_, kb_ = jax.random.split(k)
        w = 0.05 * jax.random.normal(
            kw_, (cfg['cout'], cfg['cin'], cfg['ksize'], cfg['ksize']), jnp.float32)
        b = 0.05 * jax.random.normal(kb_, (cfg['cout'],), jnp.float32)
        convs.append((w, b))
    kw_, kb_ = jax.random.split(keys[-1])
    w_final = 0.05 * jax.random.normal(kw_, (style_dim, out_dim, 1, 1), jnp.float32)
    b_final = 0.05 * jax.random.normal(kb_, (style_dim,), jnp.float32)

    packed, wf_exp, bf = pack_params(plan, convs, w_final, b_final, style_dim, style_pad)
    forward = jax.jit(make_forward(plan, style_dim, N, style_pad))

    y = jax.block_until_ready(forward(x, packed, wf_exp, bf))
    assert y.shape == (N, style_dim, 1, 1), y.shape
    assert bool(jnp.all(jnp.isfinite(y)))

    y_ref = _reference_forward(x, convs, w_final, b_final, plan, style_dim)
    max_err = float(jnp.max(jnp.abs(y - y_ref)))
    assert max_err < 2e-2, f"mismatch vs f32 reference: {max_err}"

    print("KERNEL_OK")
</pallas_src>

<mosaic_0001>
module attributes {stable_mosaic.version = 11 : i64} {
  func.func @kernel(%arg0: i32, %arg1: memref<1x22x128xbf16, #tpu.memory_space<vmem>>, %arg2: memref<896x128xbf16, #tpu.memory_space<vmem>>, %arg3: memref<1x128xf32, #tpu.memory_space<vmem>>, %arg4: memref<512x128xbf16, #tpu.memory_space<vmem>>, %arg5: memref<1x128xf32, #tpu.memory_space<vmem>>, %arg6: memref<512x128xbf16, #tpu.memory_space<vmem>>, %arg7: memref<1x128xf32, #tpu.memory_space<vmem>>, %arg8: memref<128x128xf32, #tpu.memory_space<vmem>>, %arg9: memref<1x128xf32, #tpu.memory_space<vmem>>, %arg10: memref<1x1x128xf32, #tpu.memory_space<vmem>>, %arg11: memref<16x896xbf16, #tpu.memory_space<vmem>>, %arg12: memref<9x256xf32, #tpu.memory_space<vmem>>, %arg13: memref<8x512xf32, #tpu.memory_space<vmem>>, %arg14: memref<5x256xf32, #tpu.memory_space<vmem>>, %arg15: memref<4x512xf32, #tpu.memory_space<vmem>>) attributes {dimension_semantics = [#tpu.dimension_semantics<parallel>], iteration_bounds = array<i64: 2>, scalar_prefetch = 0 : i64, scratch_operands = 5 : i64, tpu.core_type = #tpu.core_type<tc>, window_params = [{transform_indices = @transform_0, window_bounds = array<i64: 1, 22, 128>}, {pipeline_mode = #tpu.pipeline_mode<synchronous>, transform_indices = @transform_1, window_bounds = array<i64: 896, 128>}, {pipeline_mode = #tpu.pipeline_mode<synchronous>, transform_indices = @transform_2, window_bounds = array<i64: 1, 128>}, {pipeline_mode = #tpu.pipeline_mode<synchronous>, transform_indices = @transform_3, window_bounds = array<i64: 512, 128>}, {pipeline_mode = #tpu.pipeline_mode<synchronous>, transform_indices = @transform_4, window_bounds = array<i64: 1, 128>}, {pipeline_mode = #tpu.pipeline_mode<synchronous>, transform_indices = @transform_5, window_bounds = array<i64: 512, 128>}, {pipeline_mode = #tpu.pipeline_mode<synchronous>, transform_indices = @transform_6, window_bounds = array<i64: 1, 128>}, {pipeline_mode = #tpu.pipeline_mode<synchronous>, transform_indices = @transform_7, window_bounds = array<i64: 128, 128>}, {pipeline_mode = #tpu.pipeline_mode<synchronous>, transform_indices = @transform_8, window_bounds = array<i64: 1, 128>}, {transform_indices = @transform_9, window_bounds = array<i64: 1, 1, 128>}]} {
    %c0 = arith.constant 0 : index
    %c0_0 = arith.constant 0 : index
    %c0_1 = arith.constant 0 : index
    %0 = vector.load %arg1[%c0, %c0_0, %c0_1] : memref<1x22x128xbf16, #tpu.memory_space<vmem>>, vector<1x16x128xbf16>
    %1 = vector.shape_cast %0 : vector<1x16x128xbf16> to vector<16x128xbf16>
    %c0_2 = arith.constant 0 : index
    %c0_3 = arith.constant 0 : index
    %2 = vector.load %arg11[%c0_2, %c0_3] : memref<16x896xbf16, #tpu.memory_space<vmem>>, vector<16x128xbf16>
    tpu.vector_store %arg11[%c0_2, %c0_3], %1 {strides = array<i32>} : memref<16x896xbf16, #tpu.memory_space<vmem>>, vector<16x128xbf16>,
    %c0_4 = arith.constant 0 : index
    %c1 = arith.constant 1 : index
    %c0_5 = arith.constant 0 : index
    %3 = vector.load %arg1[%c0_4, %c1, %c0_5] : memref<1x22x128xbf16, #tpu.memory_space<vmem>>, vector<1x16x128xbf16>
    %4 = vector.shape_cast %3 : vector<1x16x128xbf16> to vector<16x128xbf16>
    %c0_6 = arith.constant 0 : index
    %c128 = arith.constant 128 : index
    %5 = vector.load %arg11[%c0_6, %c128] : memref<16x896xbf16, #tpu.memory_space<vmem>>, vector<16x128xbf16>
    tpu.vector_store %arg11[%c0_6, %c128], %4 {strides = array<i32>} : memref<16x896xbf16, #tpu.memory_space<vmem>>, vector<16x128xbf16>,
    %c0_7 = arith.constant 0 : index
    %c2 = arith.constant 2 : index
    %c0_8 = arith.constant 0 : index
    %6 = vector.load %arg1[%c0_7, %c2, %c0_8] : memref<1x22x128xbf16, #tpu.memory_space<vmem>>, vector<1x16x128xbf16>
    %7 = vector.shape_cast %6 : vector<1x16x128xbf16> to vector<16x128xbf16>
    %c0_9 = arith.constant 0 : index
    %c256 = arith.constant 256 : index
    %8 = vector.load %arg11[%c0_9, %c256] : memref<16x896xbf16, #tpu.memory_space<vmem>>, vector<16x128xbf16>
    tpu.vector_store %arg11[%c0_9, %c256], %7 {strides = array<i32>} : memref<16x896xbf16, #tpu.memory_space<vmem>>, vector<16x128xbf16>,
    %c0_10 = arith.constant 0 : index
    %c3 = arith.constant 3 : index
    %c0_11 = arith.constant 0 : index
    %9 = vector.load %arg1[%c0_10, %c3, %c0_11] : memref<1x22x128xbf16, #tpu.memory_space<vmem>>, vector<1x16x128xbf16>
    %10 = vector.shape_cast %9 : vector<1x16x128xbf16> to vector<16x128xbf16>
    %c0_12 = arith.constant 0 : index
    %c384 = arith.constant 384 : index
    %11 = vector.load %arg11[%c0_12, %c384] : memref<16x896xbf16, #tpu.memory_space<vmem>>, vector<16x128xbf16>
    tpu.vector_store %arg11[%c0_12, %c384], %10 {strides = array<i32>} : memref<16x896xbf16, #tpu.memory_space<vmem>>, vector<16x128xbf16>,
    %c0_13 = arith.constant 0 : index
    %c4 = arith.constant 4 : index
    %c0_14 = arith.constant 0 : index
    %12 = vector.load %arg1[%c0_13, %c4, %c0_14] : memref<1x22x128xbf16, #tpu.memory_space<vmem>>, vector<1x16x128xbf16>
    %13 = vector.shape_cast %12 : vector<1x16x128xbf16> to vector<16x128xbf16>
    %c0_15 = arith.constant 0 : index
    %c512 = arith.constant 512 : index
    %14 = vector.load %arg11[%c0_15, %c512] : memref<16x896xbf16, #tpu.memory_space<vmem>>, vector<16x128xbf16>
    tpu.vector_store %arg11[%c0_15, %c512], %13 {strides = array<i32>} : memref<16x896xbf16, #tpu.memory_space<vmem>>, vector<16x128xbf16>,
    %c0_16 = arith.constant 0 : index
    %c5 = arith.constant 5 : index
    %c0_17 = arith.constant 0 : index
    %15 = vector.load %arg1[%c0_16, %c5, %c0_17] : memref<1x22x128xbf16, #tpu.memory_space<vmem>>, vector<1x16x128xbf16>
    %16 = vector.shape_cast %15 : vector<1x16x128xbf16> to vector<16x128xbf16>
    %c0_18 = arith.constant 0 : index
    %c640 = arith.constant 640 : index
    %17 = vector.load %arg11[%c0_18, %c640] : memref<16x896xbf16, #tpu.memory_space<vmem>>, vector<16x128xbf16>
    tpu.vector_store %arg11[%c0_18, %c640], %16 {strides = array<i32>} : memref<16x896xbf16, #tpu.memory_space<vmem>>, vector<16x128xbf16>,
    %c0_19 = arith.constant 0 : index
    %c6 = arith.constant 6 : index
    %c0_20 = arith.constant 0 : index
    %18 = vector.load %arg1[%c0_19, %c6, %c0_20] : memref<1x22x128xbf16, #tpu.memory_space<vmem>>, vector<1x16x128xbf16>
    %19 = vector.shape_cast %18 : vector<1x16x128xbf16> to vector<16x128xbf16>
    %c0_21 = arith.constant 0 : index
    %c768 = arith.constant 768 : index
    %20 = vector.load %arg11[%c0_21, %c768] : memref<16x896xbf16, #tpu.memory_space<vmem>>, vector<16x128xbf16>
    tpu.vector_store %arg11[%c0_21, %c768], %19 {strides = array<i32>} : memref<16x896xbf16, #tpu.memory_space<vmem>>, vector<16x128xbf16>,
    %c0_22 = arith.constant 0 : index
    %c0_23 = arith.constant 0 : index
    %21 = vector.load %arg11[%c0_22, %c0_23] : memref<16x896xbf16, #tpu.memory_space<vmem>>, vector<16x896xbf16>
    %c0_24 = arith.constant 0 : index
    %c0_25 = arith.constant 0 : index
    %22 = vector.load %arg2[%c0_24, %c0_25] : memref<896x128xbf16, #tpu.memory_space<vmem>>, vector<896x128xbf16>
    %cst = arith.constant dense<0.000000e+00> : vector<16x128xf32>
    %23 = tpu.matmul %21, %22, %cst {dimension_numbers = #tpu.dot_dimension_numbers<[1], [0], [0], [1], [0, 0, 1, 1], [], []>} : vector<16x896xbf16>, vector<896x128xbf16>, vector<16x128xf32> -> vector<16x128xf32>
    %c0_26 = arith.constant 0 : index
    %c0_27 = arith.constant 0 : index
    %24 = vector.load %arg3[%c0_26, %c0_27] : memref<1x128xf32, #tpu.memory_space<vmem>>, vector<1x128xf32>
    %25 = vector.broadcast %24 : vector<1x128xf32> to vector<16x128xf32>
    %26 = arith.addf %23, %25 : vector<16x128xf32>
    %cst_28 = arith.constant 0.000000e+00 : f32
    %27 = vector.broadcast %cst_28 : f32 to vector<16x128xf32>
    %28 = arith.maximumf %26, %27 : vector<16x128xf32>
    %29 = vector.extract_strided_slice %28 {offsets = [1, 0], sizes = [1, 128], strides = [1, 1]} : vector<16x128xf32> to vector<1x128xf32>
    %c0_29 = arith.constant 0 : index
    %c0_30 = arith.constant 0 : index
    %30 = vector.load %arg12[%c0_29, %c0_30] : memref<9x256xf32, #tpu.memory_space<vmem>>, vector<1x128xf32>
    tpu.vector_store %arg12[%c0_29, %c0_30], %29 {strides = array<i32>} : memref<9x256xf32, #tpu.memory_space<vmem>>, vector<1x128xf32>,
    %31 = vector.extract_strided_slice %28 {offsets = [0, 0], sizes = [1, 128], strides = [1, 1]} : vector<16x128xf32> to vector<1x128xf32>
    %c0_31 = arith.constant 0 : index
    %c128_32 = arith.constant 128 : index
    %32 = vector.load %arg12[%c0_31, %c128_32] : memref<9x256xf32, #tpu.memory_space<vmem>>, vector<1x128xf32>
    tpu.vector_store %arg12[%c0_31, %c128_32], %31 {strides = array<i32>} : memref<9x256xf32, #tpu.memory_space<vmem>>, vector<1x128xf32>,
    %33 = vector.extract_strided_slice %28 {offsets = [1, 0], sizes = [1, 128], strides = [1, 1]} : vector<16x128xf32> to vector<1x128xf32>
    %c1_33 = arith.constant 1 : index
    %c0_34 = arith.constant 0 : index
    %34 = vector.load %arg12[%c1_33, %c0_34] : memref<9x256xf32, #tpu.memory_space<vmem>>, vector<1x128xf32>
    tpu.vector_store %arg12[%c1_33, %c0_34], %33 {strides = array<i32>} : memref<9x256xf32, #tpu.memory_space<vmem>>, vector<1x128xf32>,
    %35 = vector.extract_strided_slice %28 {offsets = [2, 0], sizes = [1, 128], strides = [1, 1]} : vector<16x128xf32> to vector<1x128xf32>
    %c1_35 = arith.constant 1 : index
    %c128_36 = arith.constant 128 : index
    %36 = vector.load %arg12[%c1_35, %c128_36] : memref<9x256xf32, #tpu.memory_space<vmem>>, vector<1x128xf32>
    tpu.vector_store %arg12[%c1_35, %c128_36], %35 {strides = array<i32>} : memref<9x256xf32, #tpu.memory_space<vmem>>, vector<1x128xf32>,
    %37 = vector.extract_strided_slice %28 {offsets = [3, 0], sizes = [1, 128], strides = [1, 1]} : vector<16x128xf32> to vector<1x128xf32>
    %c2_37 = arith.constant 2 : index
    %c0_38 = arith.constant 0 : index
    %38 = vector.load %arg12[%c2_37, %c0_38] : memref<9x256xf32, #tpu.memory_space<vmem>>, vector<1x128xf32>
    tpu.vector_store %arg12[%c2_37, %c0_38], %37 {strides = array<i32>} : memref<9x256xf32, #tpu.memory_space<vmem>>, vector<1x128xf32>,
    %39 = vector.extract_strided_slice %28 {offsets = [4, 0], sizes = [1, 128], strides = [1, 1]} : vector<16x128xf32> to vector<1x128xf32>
    %c2_39 = arith.constant 2 : index
    %c128_40 = arith.constant 128 : index
    %40 = vector.load %arg12[%c2_39, %c128_40] : memref<9x256xf32, #tpu.memory_space<vmem>>, vector<1x128xf32>
    tpu.vector_store %arg12[%c2_39, %c128_40], %39 {strides = array<i32>} : memref<9x256xf32, #tpu.memory_space<vmem>>, vector<1x128xf32>,
    %41 = vector.extract_strided_slice %28 {offsets = [5, 0], sizes = [1, 128], strides = [1, 1]} : vector<16x128xf32> to vector<1x128xf32>
    %c3_41 = arith.constant 3 : index
    %c0_42 = arith.constant 0 : index
    %42 = vector.load %arg12[%c3_41, %c0_42] : memref<9x256xf32, #tpu.memory_space<vmem>>, vector<1x128xf32>
    tpu.vector_store %arg12[%c3_41, %c0_42], %41 {strides = array<i32>} : memref<9x256xf32, #tpu.memory_space<vmem>>, vector<1x128xf32>,
    %43 = vector.extract_strided_slice %28 {offsets = [6, 0], sizes = [1, 128], strides = [1, 1]} : vector<16x128xf32> to vector<1x128xf32>
    %c3_43 = arith.constant 3 : index
    %c128_44 = arith.constant 128 : index
    %44 = vector.load %arg12[%c3_43, %c128_44] : memref<9x256xf32, #tpu.memory_space<vmem>>, vector<1x128xf32>
    tpu.vector_store %arg12[%c3_43, %c128_44], %43 {strides = array<i32>} : memref<9x256xf32, #tpu.memory_space<vmem>>, vector<1x128xf32>,
    %45 = vector.extract_strided_slice %28 {offsets = [7, 0], sizes = [1, 128], strides = [1, 1]} : vector<16x128xf32> to vector<1x128xf32>
    %c4_45 = arith.constant 4 : index
    %c0_46 = arith.constant 0 : index
    %46 = vector.load %arg12[%c4_45, %c0_46] : memref<9x256xf32, #tpu.memory_space<vmem>>, vector<1x128xf32>
    tpu.vector_store %arg12[%c4_45, %c0_46], %45 {strides = array<i32>} : memref<9x256xf32, #tpu.memory_space<vmem>>, vector<1x128xf32>,
    %47 = vector.extract_strided_slice %28 {offsets = [8, 0], sizes = [1, 128], strides = [1, 1]} : vector<16x128xf32> to vector<1x128xf32>
    %c4_47 = arith.constant 4 : index
    %c128_48 = arith.constant 128 : index
    %48 = vector.load %arg12[%c4_47, %c128_48] : memref<9x256xf32, #tpu.memory_space<vmem>>, vector<1x128xf32>
    tpu.vector_store %arg12[%c4_47, %c128_48], %47 {strides = array<i32>} : memref<9x256xf32, #tpu.memory_space<vmem>>, vector<1x128xf32>,
    %49 = vector.extract_strided_slice %28 {offsets = [9, 0], sizes = [1, 128], strides = [1, 1]} : vector<16x128xf32> to vector<1x128xf32>
    %c5_49 = arith.constant 5 : index
    %c0_50 = arith.constant 0 : index
    %50 = vector.load %arg12[%c5_49, %c0_50] : memref<9x256xf32, #tpu.memory_space<vmem>>, vector<1x128xf32>
    tpu.vector_store %arg12[%c5_49, %c0_50], %49 {strides = array<i32>} : memref<9x256xf32, #tpu.memory_space<vmem>>, vector<1x128xf32>,
    %51 = vector.extract_strided_slice %28 {offsets = [10, 0], sizes = [1, 128], strides = [1, 1]} : vector<16x128xf32> to vector<1x128xf32>
    %c5_51 = arith.constant 5 : index
    %c128_52 = arith.constant 128 : index
    %52 = vector.load %arg12[%c5_51, %c128_52] : memref<9x256xf32, #tpu.memory_space<vmem>>, vector<1x128xf32>
    tpu.vector_store %arg12[%c5_51, %c128_52], %51 {strides = array<i32>} : memref<9x256xf32, #tpu.memory_space<vmem>>, vector<1x128xf32>,
    %53 = vector.extract_strided_slice %28 {offsets = [11, 0], sizes = [1, 128], strides = [1, 1]} : vector<16x128xf32> to vector<1x128xf32>
    %c6_53 = arith.constant 6 : index
    %c0_54 = arith.constant 0 : index
    %54 = vector.load %arg12[%c6_53, %c0_54] : memref<9x256xf32, #tpu.memory_space<vmem>>, vector<1x128xf32>
    tpu.vector_store %arg12[%c6_53, %c0_54], %53 {strides = array<i32>} : memref<9x256xf32, #tpu.memory_space<vmem>>, vector<1x128xf32>,
    %55 = vector.extract_strided_slice %28 {offsets = [12, 0], sizes = [1, 128], strides = [1, 1]} : vector<16x128xf32> to vector<1x128xf32>
    %c6_55 = arith.constant 6 : index
    %c128_56 = arith.constant 128 : index
    %56 = vector.load %arg12[%c6_55, %c128_56] : memref<9x256xf32, #tpu.memory_space<vmem>>, vector<1x128xf32>
    tpu.vector_store %arg12[%c6_55, %c128_56], %55 {strides = array<i32>} : memref<9x256xf32, #tpu.memory_space<vmem>>, vector<1x128xf32>,
    %57 = vector.extract_strided_slice %28 {offsets = [13, 0], sizes = [1, 128], strides = [1, 1]} : vector<16x128xf32> to vector<1x128xf32>
    %c7 = arith.constant 7 : index
    %c0_57 = arith.constant 0 : index
    %58 = vector.load %arg12[%c7, %c0_57] : memref<9x256xf32, #tpu.memory_space<vmem>>, vector<1x128xf32>
    tpu.vector_store %arg12[%c7, %c0_57], %57 {strides = array<i32>} : memref<9x256xf32, #tpu.memory_space<vmem>>, vector<1x128xf32>,
    %59 = vector.extract_strided_slice %28 {offsets = [14, 0], sizes = [1, 128], strides = [1, 1]} : vector<16x128xf32> to vector<1x128xf32>
    %c7_58 = arith.constant 7 : index
    %c128_59 = arith.constant 128 : index
    %60 = vector.load %arg12[%c7_58, %c128_59] : memref<9x256xf32, #tpu.memory_space<vmem>>, vector<1x128xf32>
    tpu.vector_store %arg12[%c7_58, %c128_59], %59 {strides = array<i32>} : memref<9x256xf32, #tpu.memory_space<vmem>>, vector<1x128xf32>,
    %61 = vector.extract_strided_slice %28 {offsets = [15, 0], sizes = [1, 128], strides = [1, 1]} : vector<16x128xf32> to vector<1x128xf32>
    %c8 = arith.constant 8 : index
    %c0_60 = arith.constant 0 : index
    %62 = vector.load %arg12[%c8, %c0_60] : memref<9x256xf32, #tpu.memory_space<vmem>>, vector<1x128xf32>
    tpu.vector_store %arg12[%c8, %c0_60], %61 {strides = array<i32>} : memref<9x256xf32, #tpu.memory_space<vmem>>, vector<1x128xf32>,
    %63 = vector.extract_strided_slice %28 {offsets = [14, 0], sizes = [1, 128], strides = [1, 1]} : vector<16x128xf32> to vector<1x128xf32>
    %c8_61 = arith.constant 8 : index
    %c128_62 = arith.constant 128 : index
    %64 = vector.load %arg12[%c8_61, %c128_62] : memref<9x256xf32, #tpu.memory_space<vmem>>, vector<1x128xf32>
    tpu.vector_store %arg12[%c8_61, %c128_62], %63 {strides = array<i32>} : memref<9x256xf32, #tpu.memory_space<vmem>>, vector<1x128xf32>,
    %c0_63 = arith.constant 0 : index
    %c0_64 = arith.constant 0 : index
    %65 = vector.load %arg12[%c0_63, %c0_64] : memref<9x256xf32, #tpu.memory_space<vmem>>, vector<8x128xf32>
    %c0_65 = arith.constant 0 : index
    %c0_66 = arith.constant 0 : index
    %66 = vector.load %arg13[%c0_65, %c0_66] : memref<8x512xf32, #tpu.memory_space<vmem>>, vector<8x128xf32>
    tpu.vector_store %arg13[%c0_65, %c0_66], %65 {strides = array<i32>} : memref<8x512xf32, #tpu.memory_space<vmem>>, vector<8x128xf32>,
    %c0_67 = arith.constant 0 : index
    %c128_68 = arith.constant 128 : index
    %67 = vector.load %arg12[%c0_67, %c128_68] : memref<9x256xf32, #tpu.memory_space<vmem>>, vector<8x128xf32>
    %c0_69 = arith.constant 0 : index
    %c128_70 = arith.constant 128 : index
    %68 = vector.load %arg13[%c0_69, %c128_70] : memref<8x512xf32, #tpu.memory_space<vmem>>, vector<8x128xf32>
    tpu.vector_store %arg13[%c0_69, %c128_70], %67 {strides = array<i32>} : memref<8x512xf32, #tpu.memory_space<vmem>>, vector<8x128xf32>,
    %c1_71 = arith.constant 1 : index
    %c0_72 = arith.constant 0 : index
    %69 = vector.load %arg12[%c1_71, %c0_72] : memref<9x256xf32, #tpu.memory_space<vmem>>, vector<8x128xf32>
    %c0_73 = arith.constant 0 : index
    %c256_74 = arith.constant 256 : index
    %70 = vector.load %arg13[%c0_73, %c256_74] : memref<8x512xf32, #tpu.memory_space<vmem>>, vector<8x128xf32>
    tpu.vector_store %arg13[%c0_73, %c256_74], %69 {strides = array<i32>} : memref<8x512xf32, #tpu.memory_space<vmem>>, vector<8x128xf32>,
    %c1_75 = arith.constant 1 : index
    %c128_76 = arith.constant 128 : index
    %71 = vector.load %arg12[%c1_75, %c128_76] : memref<9x256xf32, #tpu.memory_space<vmem>>, vector<8x128xf32>
    %c0_77 = arith.constant 0 : index
    %c384_78 = arith.constant 384 : index
    %72 = vector.load %arg13[%c0_77, %c384_78] : memref<8x512xf32, #tpu.memory_space<vmem>>, vector<8x128xf32>
    tpu.vector_store %arg13[%c0_77, %c384_78], %71 {strides = array<i32>} : memref<8x512xf32, #tpu.memory_space<vmem>>, vector<8x128xf32>,
    %c0_79 = arith.constant 0 : index
    %c0_80 = arith.constant 0 : index
    %73 = vector.load %arg13[%c0_79, %c0_80] : memref<8x512xf32, #tpu.memory_space<vmem>>, vector<8x512xf32>
    %74 = arith.truncf %73 : vector<8x512xf32> to vector<8x512xbf16>
    %c0_81 = arith.constant 0 : index
    %c0_82 = arith.constant 0 : index
    %75 = vector.load %arg4[%c0_81, %c0_82] : memref<512x128xbf16, #tpu.memory_space<vmem>>, vector<512x128xbf16>
    %cst_83 = arith.constant dense<0.000000e+00> : vector<8x128xf32>
    %76 = tpu.matmul %74, %75, %cst_83 {dimension_numbers = #tpu.dot_dimension_numbers<[1], [0], [0], [1], [0, 0, 1, 1], [], []>} : vector<8x512xbf16>, vector<512x128xbf16>, vector<8x128xf32> -> vector<8x128xf32>
    %c0_84 = arith.constant 0 : index
    %c0_85 = arith.constant 0 : index
    %77 = vector.load %arg5[%c0_84, %c0_85] : memref<1x128xf32, #tpu.memory_space<vmem>>, vector<1x128xf32>
    %78 = vector.broadcast %77 : vector<1x128xf32> to vector<8x128xf32>
    %79 = arith.addf %76, %78 : vector<8x128xf32>
    %cst_86 = arith.constant 0.000000e+00 : f32
    %80 = vector.broadcast %cst_86 : f32 to vector<8x128xf32>
    %81 = arith.maximumf %79, %80 : vector<8x128xf32>
    %82 = vector.extract_strided_slice %81 {offsets = [1, 0], sizes = [1, 128], strides = [1, 1]} : vector<8x128xf32> to vector<1x128xf32>
    %c0_87 = arith.constant 0 : index
    %c0_88 = arith.constant 0 : index
    %83 = vector.load %arg14[%c0_87, %c0_88] : memref<5x256xf32, #tpu.memory_space<vmem>>, vector<1x128xf32>
    tpu.vector_store %arg14[%c0_87, %c0_88], %82 {strides = array<i32>} : memref<5x256xf32, #tpu.memory_space<vmem>>, vector<1x128xf32>,
    %84 = vector.extract_strided_slice %81 {offsets = [0, 0], sizes = [1, 128], strides = [1, 1]} : vector<8x128xf32> to vector<1x128xf32>
    %c0_89 = arith.constant 0 : index
    %c128_90 = arith.constant 128 : index
    %85 = vector.load %arg14[%c0_89, %c128_90] : memref<5x256xf32, #tpu.memory_space<vmem>>, vector<1x128xf32>
    tpu.vector_store %arg14[%c0_89, %c128_90], %84 {strides = array<i32>} : memref<5x256xf32, #tpu.memory_space<vmem>>, vector<1x128xf32>,
    %86 = vector.extract_strided_slice %81 {offsets = [1, 0], sizes = [1, 128], strides = [1, 1]} : vector<8x128xf32> to vector<1x128xf32>
    %c1_91 = arith.constant 1 : index
    %c0_92 = arith.constant 0 : index
    %87 = vector.load %arg14[%c1_91, %c0_92] : memref<5x256xf32, #tpu.memory_space<vmem>>, vector<1x128xf32>
    tpu.vector_store %arg14[%c1_91, %c0_92], %86 {strides = array<i32>} : memref<5x256xf32, #tpu.memory_space<vmem>>, vector<1x128xf32>,
    %88 = vector.extract_strided_slice %81 {offsets = [2, 0], sizes = [1, 128], strides = [1, 1]} : vector<8x128xf32> to vector<1x128xf32>
    %c1_93 = arith.constant 1 : index
    %c128_94 = arith.constant 128 : index
    %89 = vector.load %arg14[%c1_93, %c128_94] : memref<5x256xf32, #tpu.memory_space<vmem>>, vector<1x128xf32>
    tpu.vector_store %arg14[%c1_93, %c128_94], %88 {strides = array<i32>} : memref<5x256xf32, #tpu.memory_space<vmem>>, vector<1x128xf32>,
    %90 = vector.extract_strided_slice %81 {offsets = [3, 0], sizes = [1, 128], strides = [1, 1]} : vector<8x128xf32> to vector<1x128xf32>
    %c2_95 = arith.constant 2 : index
    %c0_96 = arith.constant 0 : index
    %91 = vector.load %arg14[%c2_95, %c0_96] : memref<5x256xf32, #tpu.memory_space<vmem>>, vector<1x128xf32>
    tpu.vector_store %arg14[%c2_95, %c0_96], %90 {strides = array<i32>} : memref<5x256xf32, #tpu.memory_space<vmem>>, vector<1x128xf32>,
    %92 = vector.extract_strided_slice %81 {offsets = [4, 0], sizes = [1, 128], strides = [1, 1]} : vector<8x128xf32> to vector<1x128xf32>
    %c2_97 = arith.constant 2 : index
    %c128_98 = arith.constant 128 : index
    %93 = vector.load %arg14[%c2_97, %c128_98] : memref<5x256xf32, #tpu.memory_space<vmem>>, vector<1x128xf32>
    tpu.vector_store %arg14[%c2_97, %c128_98], %92 {strides = array<i32>} : memref<5x256xf32, #tpu.memory_space<vmem>>, vector<1x128xf32>,
    %94 = vector.extract_strided_slice %81 {offsets = [5, 0], sizes = [1, 128], strides = [1, 1]} : vector<8x128xf32> to vector<1x128xf32>
    %c3_99 = arith.constant 3 : index
    %c0_100 = arith.constant 0 : index
    %95 = vector.load %arg14[%c3_99, %c0_100] : memref<5x256xf32, #tpu.memory_space<vmem>>, vector<1x128xf32>
    tpu.vector_store %arg14[%c3_99, %c0_100], %94 {strides = array<i32>} : memref<5x256xf32, #tpu.memory_space<vmem>>, vector<1x128xf32>,
    %96 = vector.extract_strided_slice %81 {offsets = [6, 0], sizes = [1, 128], strides = [1, 1]} : vector<8x128xf32> to vector<1x128xf32>
    %c3_101 = arith.constant 3 : index
    %c128_102 = arith.constant 128 : index
    %97 = vector.load %arg14[%c3_101, %c128_102] : memref<5x256xf32, #tpu.memory_space<vmem>>, vector<1x128xf32>
    tpu.vector_store %arg14[%c3_101, %c128_102], %96 {strides = array<i32>} : memref<5x256xf32, #tpu.memory_space<vmem>>, vector<1x128xf32>,
    %98 = vector.extract_strided_slice %81 {offsets = [7, 0], sizes = [1, 128], strides = [1, 1]} : vector<8x128xf32> to vector<1x128xf32>
    %c4_103 = arith.constant 4 : index
    %c0_104 = arith.constant 0 : index
    %99 = vector.load %arg14[%c4_103, %c0_104] : memref<5x256xf32, #tpu.memory_space<vmem>>, vector<1x128xf32>
    tpu.vector_store %arg14[%c4_103, %c0_104], %98 {strides = array<i32>} : memref<5x256xf32, #tpu.memory_space<vmem>>, vector<1x128xf32>,
    %100 = vector.extract_strided_slice %81 {offsets = [6, 0], sizes = [1, 128], strides = [1, 1]} : vector<8x128xf32> to vector<1x128xf32>
    %c4_105 = arith.constant 4 : index
    %c128_106 = arith.constant 128 : index
    %101 = vector.load %arg14[%c4_105, %c128_106] : memref<5x256xf32, #tpu.memory_space<vmem>>, vector<1x128xf32>
    tpu.vector_store %arg14[%c4_105, %c128_106], %100 {strides = array<i32>} : memref<5x256xf32, #tpu.memory_space<vmem>>, vector<1x128xf32>,
    %c0_107 = arith.constant 0 : index
    %c0_108 = arith.constant 0 : index
    %102 = vector.load %arg14[%c0_107, %c0_108] : memref<5x256xf32, #tpu.memory_space<vmem>>, vector<4x128xf32>
    %c0_109 = arith.constant 0 : index
    %c0_110 = arith.constant 0 : index
    %103 = vector.load %arg15[%c0_109, %c0_110] : memref<4x512xf32, #tpu.memory_space<vmem>>, vector<4x128xf32>
    tpu.vector_store %arg15[%c0_109, %c0_110], %102 {strides = array<i32>} : memref<4x512xf32, #tpu.memory_space<vmem>>, vector<4x128xf32>,
    %c0_111 = arith.constant 0 : index
    %c128_112 = arith.constant 128 : index
    %104 = vector.load %arg14[%c0_111, %c128_112] : memref<5x256xf32, #tpu.memory_space<vmem>>, vector<4x128xf32>
    %c0_113 = arith.constant 0 : index
    %c128_114 = arith.constant 128 : index
    %105 = vector.load %arg15[%c0_113, %c128_114] : memref<4x512xf32, #tpu.memory_space<vmem>>, vector<4x128xf32>
    tpu.vector_store %arg15[%c0_113, %c128_114], %104 {strides = array<i32>} : memref<4x512xf32, #tpu.memory_space<vmem>>, vector<4x128xf32>,
    %c1_115 = arith.constant 1 : index
    %c0_116 = arith.constant 0 : index
    %106 = vector.load %arg14[%c1_115, %c0_116] : memref<5x256xf32, #tpu.memory_space<vmem>>, vector<4x128xf32>
    %c0_117 = arith.constant 0 : index
    %c256_118 = arith.constant 256 : index
    %107 = vector.load %arg15[%c0_117, %c256_118] : memref<4x512xf32, #tpu.memory_space<vmem>>, vector<4x128xf32>
    tpu.vector_store %arg15[%c0_117, %c256_118], %106 {strides = array<i32>} : memref<4x512xf32, #tpu.memory_space<vmem>>, vector<4x128xf32>,
    %c1_119 = arith.constant 1 : index
    %c128_120 = arith.constant 128 : index
    %108 = vector.load %arg14[%c1_119, %c128_120] : memref<5x256xf32, #tpu.memory_space<vmem>>, vector<4x128xf32>
    %c0_121 = arith.constant 0 : index
    %c384_122 = arith.constant 384 : index
    %109 = vector.load %arg15[%c0_121, %c384_122] : memref<4x512xf32, #tpu.memory_space<vmem>>, vector<4x128xf32>
    tpu.vector_store %arg15[%c0_121, %c384_122], %108 {strides = array<i32>} : memref<4x512xf32, #tpu.memory_space<vmem>>, vector<4x128xf32>,
    %c0_123 = arith.constant 0 : index
    %c0_124 = arith.constant 0 : index
    %110 = vector.load %arg15[%c0_123, %c0_124] : memref<4x512xf32, #tpu.memory_space<vmem>>, vector<4x512xf32>
    %111 = arith.truncf %110 : vector<4x512xf32> to vector<4x512xbf16>
    %c0_125 = arith.constant 0 : index
    %c0_126 = arith.constant 0 : index
    %112 = vector.load %arg6[%c0_125, %c0_126] : memref<512x128xbf16, #tpu.memory_space<vmem>>, vector<512x128xbf16>
    %cst_127 = arith.constant dense<0.000000e+00> : vector<4x128xf32>
    %113 = tpu.matmul %111, %112, %cst_127 {dimension_numbers = #tpu.dot_dimension_numbers<[1], [0], [0], [1], [0, 0, 1, 1], [], []>} : vector<4x512xbf16>, vector<512x128xbf16>, vector<4x128xf32> -> vector<4x128xf32>
    %c0_128 = arith.constant 0 : index
    %c0_129 = arith.constant 0 : index
    %114 = vector.load %arg7[%c0_128, %c0_129] : memref<1x128xf32, #tpu.memory_space<vmem>>, vector<1x128xf32>
    %115 = vector.broadcast %114 : vector<1x128xf32> to vector<4x128xf32>
    %116 = arith.addf %113, %115 : vector<4x128xf32>
    %cst_130 = arith.constant 0.000000e+00 : f32
    %117 = vector.broadcast %cst_130 : f32 to vector<4x128xf32>
    %118 = arith.maximumf %116, %117 : vector<4x128xf32>
    %cst_131 = arith.constant dense<0.000000e+00> : vector<128xf32>
    %119 = vector.multi_reduction <add>, %118, %cst_131 [0] : vector<4x128xf32> to vector<128xf32>
    %120 = vector.shape_cast %119 : vector<128xf32> to vector<1x128xf32>
    %cst_132 = arith.constant 6.250000e-02 : f32
    %121 = vector.broadcast %cst_132 : f32 to vector<1x128xf32>
    %122 = arith.mulf %120, %121 : vector<1x128xf32>
    %c0_133 = arith.constant 0 : index
    %c0_134 = arith.constant 0 : index
    %123 = vector.load %arg8[%c0_133, %c0_134] : memref<128x128xf32, #tpu.memory_space<vmem>>, vector<128x128xf32>
    %cst_135 = arith.constant dense<0.000000e+00> : vector<1x128xf32>
    %124 = tpu.matmul %122, %123, %cst_135 {dimension_numbers = #tpu.dot_dimension_numbers<[1], [0], [0], [1], [0, 0, 1, 1], [], []>} : vector<1x128xf32>, vector<128x128xf32>, vector<1x128xf32> -> vector<1x128xf32>
    %c0_136 = arith.constant 0 : index
    %c0_137 = arith.constant 0 : index
    %125 = vector.load %arg9[%c0_136, %c0_137] : memref<1x128xf32, #tpu.memory_space<vmem>>, vector<1x128xf32>
    %126 = arith.addf %124, %125 : vector<1x128xf32>
    %c0_138 = arith.constant 0 : index
    %c0_139 = arith.constant 0 : index
    %c0_140 = arith.constant 0 : index
    %127 = vector.load %arg10[%c0_138, %c0_139, %c0_140] : memref<1x1x128xf32, #tpu.memory_space<vmem>>, vector<1x1x128xf32>
    %128 = vector.shape_cast %127 : vector<1x1x128xf32> to vector<1x128xf32>
    %129 = vector.shape_cast %126 : vector<1x128xf32> to vector<1x1x128xf32>
    tpu.vector_store %arg10[%c0_138, %c0_139, %c0_140], %129 {strides = array<i32>} : memref<1x1x128xf32, #tpu.memory_space<vmem>>, vector<1x1x128xf32>,
    return
  }
  func.func @transform_0(%arg0: i32) -> (i32, i32, i32) {
    %c0_i32 = arith.constant 0 : i32
    %c0_i32_0 = arith.constant 0 : i32
    %c0_i32_1 = arith.constant 0 : i32
    return %arg0, %c0_i32, %c0_i32_0 : i32, i32, i32
  }
  func.func @transform_1(%arg0: i32) -> (i32, i32) {
    %c0_i32 = arith.constant 0 : i32
    %c0_i32_0 = arith.constant 0 : i32
    %c0_i32_1 = arith.constant 0 : i32
    return %c0_i32, %c0_i32_0 : i32, i32
  }
  func.func @transform_2(%arg0: i32) -> (i32, i32) {
    %c0_i32 = arith.constant 0 : i32
    %c0_i32_0 = arith.constant 0 : i32
    %c0_i32_1 = arith.constant 0 : i32
    return %c0_i32, %c0_i32_0 : i32, i32
  }
  func.func @transform_3(%arg0: i32) -> (i32, i32) {
    %c0_i32 = arith.constant 0 : i32
    %c0_i32_0 = arith.constant 0 : i32
    %c0_i32_1 = arith.constant 0 : i32
    return %c0_i32, %c0_i32_0 : i32, i32
  }
  func.func @transform_4(%arg0: i32) -> (i32, i32) {
    %c0_i32 = arith.constant 0 : i32
    %c0_i32_0 = arith.constant 0 : i32
    %c0_i32_1 = arith.constant 0 : i32
    return %c0_i32, %c0_i32_0 : i32, i32
  }
  func.func @transform_5(%arg0: i32) -> (i32, i32) {
    %c0_i32 = arith.constant 0 : i32
    %c0_i32_0 = arith.constant 0 : i32
    %c0_i32_1 = arith.constant 0 : i32
    return %c0_i32, %c0_i32_0 : i32, i32
  }
  func.func @transform_6(%arg0: i32) -> (i32, i32) {
    %c0_i32 = arith.constant 0 : i32
    %c0_i32_0 = arith.constant 0 : i32
    %c0_i32_1 = arith.constant 0 : i32
    return %c0_i32, %c0_i32_0 : i32, i32
  }
  func.func @transform_7(%arg0: i32) -> (i32, i32) {
    %c0_i32 = arith.constant 0 : i32
    %c0_i32_0 = arith.constant 0 : i32
    %c0_i32_1 = arith.constant 0 : i32
    return %c0_i32, %c0_i32_0 : i32, i32
  }
  func.func @transform_8(%arg0: i32) -> (i32, i32) {
    %c0_i32 = arith.constant 0 : i32
    %c0_i32_0 = arith.constant 0 : i32
    %c0_i32_1 = arith.constant 0 : i32
    return %c0_i32, %c0_i32_0 : i32, i32
  }
  func.func @transform_9(%arg0: i32) -> (i32, i32, i32) {
    %c0_i32 = arith.constant 0 : i32
    %c0_i32_0 = arith.constant 0 : i32
    %c0_i32_1 = arith.constant 0 : i32
    return %arg0, %c0_i32, %c0_i32_0 : i32, i32, i32
  }
}

</mosaic_0001>

<bundles_post_ra>
// kernel: forward.1
= control target key start
LH: loop header
LB: loop body
LE: loop exit
PB: predicated region body
PF: predicated region fallthrough
CT: control target
= control target key end

     0   :  { %14 = vsyncpa [#allocation8], 0  ;;  %s3306_s0 = inlined_call_operand.vmem [shape: bf16[2,22,128], index: 0, kind: input, shape index: {}]   ;;  %s3307_s1 = inlined_call_operand.vmem [shape: bf16[896,128], index: 1, kind: input, shape index: {}]   ;;  %s3308_s2 = inlined_call_operand.vmem [shape: f32[1,128], index: 2, kind: input, shape index: {}]   ;;  %s3309_s3 = inlined_call_operand.hbm [shape: bf16[512,128], index: 3, kind: input, shape index: {}]   ;;  %s3310_s4 = inlined_call_operand.vmem [shape: f32[1,128], index: 4, kind: input, shape index: {}]   ;;  %s3311_s5 = inlined_call_operand.hbm [shape: bf16[512,128], index: 5, kind: input, shape index: {}]   ;;  %s3312_s6 = inlined_call_operand.vmem [shape: f32[1,128], index: 6, kind: input, shape index: {}]   ;;  %s3313_s7 = inlined_call_operand.hbm [shape: f32[128,128], index: 7, kind: input, shape index: {}]   ;;  %s3314_s8 = inlined_call_operand.vmem [shape: f32[1,128], index: 8, kind: input, shape index: {}]   ;;  %s3315_s9 = inlined_call_operand.vmem [shape: f32[2,1,128], index: 9, kind: output, shape index: {}]  }
   0x1   :  { %15 = vsyncpa [#allocation10], 0  ;;  %s2934_s30 = smov 0  }
   0x2 LB: > { %s2940_s10 = sadd.s32 4294967295, %s2873_s30   ;;  %p2219_p0 = scmp.ge.s32.totalorder %s2873_s30, 1  ;;  %s2873_s30 = sphi %s2934_s30, %s21_s30  }
   0x3   : > { %p246_p1 = scmp.lt.s32.totalorder %s2873_s30, 3  ;;  %p2624_p2 = scmp.eq.s32.totalorder %s2940_s10, 0 }
   0x4   : > { %s2875_s12 = smov [#allocation9]   ;;  %s2876_s14 = smov [#allocation7]  }
   0x5   : > { %p2945_p3 = pnand %p2219_p0, %p246_p1  ;;  %s280_s13 = sshll.u32 %s2875_s12, 4  ;;  %s281_s13 = int_to_ptr.vmem [resolvable:$true] %s280_s13 }
   0x6   : > { %s264_s15 = sshll.u32 %s2876_s14, 4  ;;  %s2877_s17 = smov [#allocation11]   ;;  %s2951_s15 = int_to_ptr.vmem [resolvable:$true] %s264_s15 }
   0x7   : > { %p2614_p4 = pneg %p2945_p3  ;;  %s296_s18 = sshll.u32 %s2877_s17, 4  ;;  %s2959_s18 = int_to_ptr.vmem [resolvable:$true] %s296_s18 }
   0x8   : > { %s2792_s19 = scalar_lea.vmem %s281_s13, 4096  ;;  %p2800_p10 = scmp.lt.s32.totalorder %s281_s13, %s281_s13 }
   0x9   : > { %p2955_p5 = pnand %p2624_p2, %p2614_p4  ;;  %p2793_p7 = scmp.ne.s32.totalorder %s281_s13, %s2792_s19 }
   0xa   : > { %p2801_p11 = scmp.lt.s32.totalorder %s2792_s19, %s2792_s19 }
   0xb   : > { %p2783_p6 = pneg %p2955_p5 }
   0xc   : > { %p2802_p12 = por %p2801_p11, %p2800_p10 }
   0xd   : > { %p2795_p8 = pnand %p2793_p7, %p2783_p6 }
   0xf   : > { %p2796_p9 = pneg %p2795_p8 }
  0x11   : > { %p2803_p13 = pnand %p2802_p12, %p2796_p9 }
  0x13   : > { %2806 = shalt.err (!%p2803_p13)
}
  0x14   : > { %s2878_s20 = smov 64   ;;  %s2879_s21 = smov 4  }
  0x15   : > { %2620 = dma.hbm_to_vmem [thread:$0]  (!%p2955_p5), %s3311_s5, 4096, %s281_s13, [#allocation10], %s2878_s20, %s2878_s20, %s2879_s21  }
  0x16   : > { %s2818_s24 = scalar_lea.vmem %s2951_s15, 4096  ;;  %p2826_p7 = scmp.lt.s32.totalorder %s2951_s15, %s2951_s15 }
  0x17   : > { %p2819_p0 = scmp.ne.s32.totalorder %s2951_s15, %s2818_s24  ;;  %p2827_p8 = scmp.lt.s32.totalorder %s2818_s24, %s2818_s24 }
  0x19   : > { %p2821_p1 = pnand %p2819_p0, %p2783_p6  ;;  %p2828_p9 = por %p2827_p8, %p2826_p7 }
  0x1b   : > { %p2822_p4 = pneg %p2821_p1 }
  0x1d   : > { %p2829_p10 = pnand %p2828_p9, %p2822_p4 }
  0x1f   : > { %2832 = shalt.err (!%p2829_p10)
}
  0x20   : > { %2617 = dma.hbm_to_vmem [thread:$0]  (!%p2955_p5), %s3309_s3, 4096, %s2951_s15, [#allocation8], %s2878_s20, %s2878_s20, %s2879_s21  }
  0x21   : > { %s2844_s27 = scalar_lea.vmem %s2959_s18, 2048  ;;  %p2852_p0 = scmp.lt.s32.totalorder %s2959_s18, %s2959_s18 }
  0x22   : > { %p2845_p11 = scmp.ne.s32.totalorder %s2959_s18, %s2844_s27  ;;  %p2853_p1 = scmp.lt.s32.totalorder %s2844_s27, %s2844_s27 }
  0x24   : > { %p2847_p12 = pnand %p2845_p11, %p2783_p6  ;;  %p2854_p4 = por %p2853_p1, %p2852_p0 }
  0x26   : > { %p2848_p13 = pneg %p2847_p12 }
  0x28   : > { %p2855_p7 = pnand %p2854_p4, %p2848_p13 }
  0x2a   : > { %2858 = shalt.err (!%p2855_p7)
}
  0x2b   : > { %s2880_s28 = smov 128   ;;  %s2881_s29 = smov 8  }
  0x2c   : > { %2623 = dma.hbm_to_vmem [thread:$0]  (!%p2955_p5), %s3313_s7, 2048, %s2959_s18, [#allocation10], %s2880_s28, %s2880_s28, %s2881_s29  }
  0x2d   : > { %323 = sbr.rel (%p2945_p3) target bundleno = 992 (0x3e0), region = 56 }
  0x32   : > { %2864 = dma.done.wait (%p2624_p2), [#allocation8], 4096  }
  0x33   : > { %2866 = vsyncadd (%p2624_p2), [#allocation8], 4294963200 }
  0x34   : > { %2868 = dma.done.wait (%p2624_p2), [#allocation10], 6144  }
  0x35   : > { %2870 = vsyncadd (%p2624_p2), [#allocation10], 4294961152  ;;  %v2647_v0 = vld [vmem:[%s3307_s1 + $0x78] sm:$0xff]   ;;  %v2651_v4 = vld [vmem:[%s3307_s1 + $0x70] sm:$0xff]   ;;  %p365_p2 = scmp.lt.s32.totalorder %s2940_s10, 1  ;;  %vm418_vm2 = vcmask 1042432  }
  0x36   : > { %v2648_v1 = vld [vmem:[%s3307_s1 + $0xf8] sm:$0xff]   ;;  %2366 = vmatprep.subr.bf16.mxu0 %v2647_v0  ;;  %v2652_v5 = vld [vmem:[%s3307_s1 + $0xf0] sm:$0xff]   ;;  %v2655_v8 = vld [vmem:[%s3307_s1 + $0x68] sm:$0xff]   ;;  %vm381_vm0 = vsmask.f32 3328  ;;  %vm419_vm3 = vcmask 1046532  }
  0x37   : > { %v2649_v2 = vld [vmem:[%s3307_s1 + $0x38] sm:$0xff]   ;;  %2388 = vmatprep.subr.bf16.mxu1 %v2648_v1  ;;  %v2653_v6 = vld [vmem:[%s3307_s1 + $0x30] sm:$0xff]   ;;  %v2656_v9 = vld [vmem:[%s3307_s1 + $0xe8] sm:$0xff]   ;;  %s3329_s10 = smov (!%p365_p2, %s2940_s10), 1  ;;  %vm382_vm1 = vsmask.f32 7440 }
  0x38   : > { %v2650_v3 = vld [vmem:[%s3307_s1 + $0xb8] sm:$0xff]   ;;  %2367 = vmatpush3.bf16.msra.mxu0 %v2649_v2  ;;  %v2654_v7 = vld [vmem:[%s3307_s1 + $0xb0] sm:$0xff]   ;;  %v2657_v10 = vld [vmem:[%s3307_s1 + $0x28] sm:$0xff]   ;;  %s2601_s27 = smul.u32 12, %s3329_s10  ;;  %vm435_vm4 = vsmask.f32 2304  ;;  %s372_s26 = scalar_lea.vmem %s3315_s9, %s3329_s10 }
  0x39   : > { %2389 = vmatpush3.bf16.msra.mxu1 %v2650_v3  ;;  %2368 = vmatprep.subr.bf16.mxu0 %v2651_v4  ;;  %v2658_v11 = vld [vmem:[%s3307_s1 + $0xa8] sm:$0xff]   ;;  %v2659_v12 = vld [vmem:[%s3307_s1 + $0x60] sm:$0xff]   ;;  %v2663_v16 = vld [vmem:[%s3307_s1 + $0x58] sm:$0xff]   ;;  %vm436_vm5 = vsmask.f32 6416  ;;  %v2882_v44 = vmov 0.0  }
  0x3a   : > { %2390 = vmatprep.subr.bf16.mxu1 %v2652_v5  ;;  %v2660_v13 = vld [vmem:[%s3307_s1 + $0xe0] sm:$0xff]   ;;  %v2664_v17 = vld [vmem:[%s3307_s1 + $0xd8] sm:$0xff]   ;;  %v2667_v20 = vld [vmem:[%s3307_s1 + $0x50] sm:$0xff]   ;;  %s3105_s19 = scalar_lea.vmem %s3306_s0, %s2601_s27  ;;  %vm476_vm9 = vcmask 1041408   ;;  %vm477_vm10 = vcmask 1045508   ;;  %vm2883_vm11 = vmmov 0  }
  0x3b   : > { %v2661_v14 = vld [vmem:[%s3307_s1 + $0x20] sm:$0xff]   ;;  %v2665_v18 = vld [vmem:[%s3307_s1 + $0x18] sm:$0xff]   ;;  %v2668_v21 = vld [vmem:[%s3307_s1 + $0xd0] sm:$0xff]   ;;  %vm493_vm13 = vsmask.f32 1280  ;;  %vm534_vm15 = vcmask 1040384  }
  0x3c   : > { %2369 = vmatpush3.bf16.msra.mxu0 %v2653_v6  ;;  %v2662_v15 = vld [vmem:[%s3307_s1 + $0xa0] sm:$0xff]   ;;  %v2666_v19 = vld [vmem:[%s3307_s1 + $0x98] sm:$0xff]   ;;  %v2669_v22 = vld [vmem:[%s3307_s1 + $0x10] sm:$0xff]   ;;  %vm494_vm14 = vsmask.f32 5392 }
  0x3d   : > { %2391 = vmatpush3.bf16.msra.mxu1 %v2654_v7  ;;  %2370 = vmatprep.subr.bf16.mxu0 %v2655_v8  ;;  %v2670_v23 = vld [vmem:[%s3307_s1 + $0x90] sm:$0xff]   ;;  %v2671_v24 = vld [vmem:[%s3307_s1 + $0x48] sm:$0xff]   ;;  %v2675_v28 = vld [vmem:[%s3307_s1 + $0x40] sm:$0xff]  }
  0x3e   : > { %2392 = vmatprep.subr.bf16.mxu1 %v2656_v9  ;;  %v2672_v25 = vld [vmem:[%s3307_s1 + $0xc8] sm:$0xff]   ;;  %v2676_v29 = vld [vmem:[%s3307_s1 + $0xc0] sm:$0xff]   ;;  %v2685_v43 = vld [vmem:[%s3307_s1 + $0x178] sm:$0xff]  }
  0x3f   : > { %v2673_v26 = vld [vmem:[%s3307_s1 + $0x8] sm:$0xff]   ;;  %v2677_v30 = vld [vmem:[%s3307_s1] sm:$0xff]   ;;  %vm3127_vm6 = vmor %vm418_vm2, %vm419_vm3  ;;  %vm1269_vm3 = vcmask 1046528  }
  0x40   : > { %2371 = vmatpush3.bf16.msra.mxu0 %v2657_v10  ;;  %v2674_v27 = vld [vmem:[%s3307_s1 + $0x88] sm:$0xff]   ;;  %v2678_v31 = vld [vmem:[%s3307_s1 + $0x80] sm:$0xff]   ;;  %vm3136_vm7 = vmor %vm381_vm0, %vm382_vm1  ;;  %vm535_vm0 = vcmask 1044484  }
  0x41   : > { %2393 = vmatpush3.bf16.msra.mxu1 %v2658_v11  ;;  %2372 = vmatprep.subr.bf16.mxu0 %v2659_v12  ;;  %v374_v32 = vld [vmem:[%s3105_s19] sm:$0xf]  ;;  %v375_v33 = vld [vmem:[%s3105_s19 + $0x4] sm:$0xf]  ;;  %v380_v36 = vld [vmem:[%s3105_s19 + $0x8] sm:$0x1] }
  0x42   : > { %2394 = vmatprep.subr.bf16.mxu1 %v2660_v13  ;;  %v378_v34 = vld [vmem:[%s3105_s19] sm:$0xf]  ;;  %376 = vst [vmem:[#allocation2] sm:$0xf] %v374_v32  ;;  %377 = vst [vmem:[#allocation2 + $0x1c] sm:$0xf] %v375_v33 }
  0x43   : > { %v379_v35 = vld [vmem:[%s3105_s19 + $0x4] sm:$0xf]  ;;  %v385_v37 = vshrl.u32 %v378_v34, 16  ;;  %v388_v38 = vshll.u32 %v378_v34, 16  ;;  %v404_v41 = vshll.u32 %v380_v36, 16  ;;  %vm437_vm8 = vmor %vm435_vm4, %vm436_vm5  ;;  %v2692_v33 = vld [vmem:[%s3307_s1 + $0x128] sm:$0xff]  }
  0x44   : > { %2373 = vmatpush3.bf16.msra.mxu0 %v2661_v14  ;;  %v394_v39 = vshll.u32 %v379_v35, 16  ;;  %v398_v40 = vshrl.u32 %v379_v35, 16  ;;  %v412_v42 = vld [vmem:[%s3105_s19] sm:$0xe]  ;;  %v413_v47 = vld [vmem:[%s3105_s19 + $0x4] sm:$0xf]  ;;  %vm3177_vm12 = vmor %vm476_vm9, %vm477_vm10 }
  0x45   : > { %2395 = vmatpush3.bf16.msra.mxu1 %v2662_v15  ;;  %2374 = vmatprep.subr.bf16.mxu0 %v2663_v16  ;;  %v387_v45 = vrot.slane %v385_v37, 4  ;;  %v390_v46 = vrot.slane %v388_v38, 5  ;;  %v414_v48 = vld [vmem:[%s3105_s19 + $0x8] sm:$0x1]  ;;  %v406_v51 = vrot.slane %v404_v41, 5  ;;  %v2229_v53 = vrot.slane %v412_v42, 9  ;;  %vm3225_vm1 = vmor %vm534_vm15, %vm535_vm0 }
  0x46   : > { %2396 = vmatprep.subr.bf16.mxu1 %v2664_v17  ;;  %v396_v49 = vrot.slane %v394_v39, 5  ;;  %v400_v50 = vrot.slane %v398_v40, 4  ;;  %v432_v54 = vld [vmem:[%s3105_s19] sm:$0xe]  ;;  %v423_v56 = vrot.slane %v413_v47, 5  ;;  %v426_v57 = vrot.slane %v414_v48, 5  ;;  %vm3232_vm2 = vmor %vm493_vm13, %vm494_vm14 }
  0x47   : > { %v391_v55 = vor.u32 %v390_v46, %v387_v45  ;;  %v433_v58 = vld [vmem:[%s3105_s19 + $0x4] sm:$0xf]  ;;  %v434_v59 = vld [vmem:[%s3105_s19 + $0x8] sm:$0x3]  ;;  %v439_v62 = vshrl.u32 %v432_v54, 16  ;;  %v442_v63 = vshll.u32 %v432_v54, 16 }
  0x48   : > { %2375 = vmatpush3.bf16.msra.mxu0 %v2665_v18  ;;  %v401_v61 = vor.u32 %v400_v50, %v396_v49  ;;  %v448_v0 = vshrl.u32 %v433_v58, 16  ;;  %v424_v2 = vsel %vm3127_vm6, %v2229_v53, %v423_v56  ;;  %v425_v3 = vrot.slane %v423_v56, 4  ;;  %v2694_v34 = vld [vmem:[%s3307_s1 + $0x160] sm:$0xff]   ;;  %v2690_v35 = vld [vmem:[%s3307_s1 + $0x1b0] sm:$0xff]   ;;  %v2697_v38 = vld [vmem:[%s3307_s1 + $0x158] sm:$0xff]  }
  0x49   : > { %2397 = vmatpush3.bf16.msra.mxu1 %v2666_v19  ;;  %2376 = vmatprep.subr.bf16.mxu0 %v2667_v20  ;;  %v392_v1 = vrot.slane %v391_v55, 4  ;;  %v451_v4 = vshll.u32 %v433_v58, 16  ;;  %430 = vst [vmem:[#allocation2 + $0x8] sm:$0xf] %v424_v2  ;;  %v441_v6 = vrot.slane %v439_v62, 5  ;;  %v444_v7 = vrot.slane %v442_v63, 6 }
  0x4a   : > { %2398 = vmatprep.subr.bf16.mxu1 %v2668_v21  ;;  %v402_v5 = vrot.slane %v401_v61, 4  ;;  %v450_v8 = vrot.slane %v448_v0, 5  ;;  %v427_v10 = vsel %vm3127_vm6, %v425_v3, %v426_v57  ;;  %v458_v12 = vshrl.u32 %v434_v59, 16  ;;  %v2695_v37 = vld [vmem:[%s3307_s1 + $0x120] sm:$0xff]   ;;  %v2693_v39 = vld [vmem:[%s3307_s1 + $0x1a8] sm:$0xff]   ;;  %v2698_v40 = vld [vmem:[%s3307_s1 + $0x118] sm:$0xff]  }
  0x4b   : > { %v397_v9 = vsel %vm3136_vm7, %v392_v1, %v396_v49  ;;  %v453_v11 = vrot.slane %v451_v4, 6  ;;  %431 = vst [vmem:[#allocation2 + $0x24] sm:$0xf] %v427_v10  ;;  %v445_v14 = vor.u32 %v444_v7, %v441_v6  ;;  %v461_v15 = vshll.u32 %v434_v59, 16  ;;  %v2696_v41 = vld [vmem:[%s3307_s1 + $0x1a0] sm:$0xff]   ;;  %v2700_v42 = vld [vmem:[%s3307_s1 + $0x150] sm:$0xff]  }
  0x4c   : > { %2377 = vmatpush3.bf16.msra.mxu0 %v2669_v22  ;;  %v407_v13 = vsel %vm3136_vm7, %v402_v5, %v406_v51  ;;  %410 = vst [vmem:[#allocation2 + $0x4] sm:$0xf] %v397_v9  ;;  %v460_v17 = vrot.slane %v458_v12, 5  ;;  %v471_v45 = vld [vmem:[%s3105_s19 + $0x4] sm:$0xf]  ;;  %v2701_v55 = vld [vmem:[%s3307_s1 + $0x110] sm:$0xff]  }
  0x4d   : > { %2399 = vmatpush3.bf16.msra.mxu1 %v2670_v23  ;;  %2378 = vmatprep.subr.bf16.mxu0 %v2671_v24  ;;  %411 = vst [vmem:[#allocation2 + $0x20] sm:$0xf] %v407_v13  ;;  %v454_v16 = vor.u32 %v453_v11, %v450_v8  ;;  %v446_v18 = vrot.slane %v445_v14, 4  ;;  %v463_v19 = vrot.slane %v461_v15, 6  ;;  %v2686_v24 = vld [vmem:[%s3307_s1 + $0x138] sm:$0xff]   ;;  %v481_v48 = vrot.slane %v471_v45, 6 }
  0x4e   : > { %2400 = vmatprep.subr.bf16.mxu1 %v2672_v25  ;;  %v2679_v25 = vld [vmem:[#allocation2] ss:$28 sps:$4 sm:$0xff]   ;;  %v472_v46 = vld [vmem:[%s3105_s19 + $0x8] sm:$0x3]  ;;  %v491_v51 = vld [vmem:[%s3105_s19 + $0x4] sm:$0xf] }
  0x4f   : > { %v456_v20 = vrot.slane %v454_v16, 4  ;;  %v455_v21 = vsel %vm437_vm8, %v446_v18, %v454_v16  ;;  %v464_v22 = vor.u32 %v463_v19, %v460_v17  ;;  %v490_v49 = vld [vmem:[%s3105_s19] sm:$0xc]  ;;  %v484_v50 = vrot.slane %v472_v46, 6  ;;  %v492_v53 = vld [vmem:[%s3105_s19 + $0x8] sm:$0x7] }
  0x50   : > { %2379 = vmatpush3.bf16.msra.mxu0 %v2673_v26  ;;  %468 = vst [vmem:[#allocation2 + $0xc] sm:$0xf] %v455_v21  ;;  %v497_v54 = vshrl.u32 %v490_v49, 16  ;;  %v483_v57 = vrot.slane %v481_v48, 4  ;;  %v500_v58 = vshll.u32 %v490_v49, 16  ;;  %v506_v59 = vshrl.u32 %v491_v51, 16 }
  0x51   : > { %2401 = vmatpush3.bf16.msra.mxu1 %v2674_v27  ;;  %2380 = vmatprep.subr.bf16.mxu0 %v2675_v28  ;;  %v465_v23 = vsel %vm437_vm8, %v456_v20, %v464_v22  ;;  %v2688_v27 = vld [vmem:[%s3307_s1 + $0x170] sm:$0xff]   ;;  %v528_v60 = vld [vmem:[%s3105_s19] sm:$0x8]  ;;  %v2699_v61 = vld [vmem:[%s3307_s1 + $0x198] sm:$0xff]   ;;  %v509_v63 = vshll.u32 %v491_v51, 16  ;;  %v516_v0 = vshrl.u32 %v492_v53, 16 }
  0x52   : > { %2402 = vmatprep.subr.bf16.mxu1 %v2676_v29  ;;  %469 = vst [vmem:[#allocation2 + $0x28] sm:$0xf] %v465_v23  ;;  %v2689_v28 = vld [vmem:[%s3307_s1 + $0x130] sm:$0xff]   ;;  %v2687_v29 = vld [vmem:[%s3307_s1 + $0x1b8] sm:$0xff]   ;;  %v499_v62 = vrot.slane %v497_v54, 6  ;;  %v519_v1 = vshll.u32 %v492_v53, 16  ;;  %v485_v4 = vsel %vm3177_vm12, %v483_v57, %v484_v50 }
  0x53   : > { %v529_v2 = vld [vmem:[%s3105_s19 + $0x4] sm:$0xf]  ;;  %v2703_v3 = vld [vmem:[%s3307_s1 + $0x148] sm:$0xff]   ;;  %v502_v5 = vrot.slane %v500_v58, 7  ;;  %v508_v6 = vrot.slane %v506_v59, 6  ;;  %v2231_v9 = vrot.slane %v528_v60, 11 }
  0x54   : > { %2381 = vmatpush3.bf16.msra.mxu0 %v2677_v30  ;;  %v2681_v26 = vld [vmem:[#allocation2 + $0x4] ss:$28 sps:$4 sm:$0xff]   ;;  %v2691_v30 = vld [vmem:[%s3307_s1 + $0x168] sm:$0xff]   ;;  %489 = vst [vmem:[#allocation2 + $0x2c] sm:$0xf] %v485_v4  ;;  %v511_v10 = vrot.slane %v509_v63, 7 }
  0x55   : > { %2403 = vmatpush3.bf16.msra.mxu1 %v2678_v31  ;;  %2410 = vmatprep.subr.bf16.mxu0 %v2685_v43  ;;  %v2682_v31 = vld [vmem:[#allocation2 + $0x8] ss:$28 sps:$4 sm:$0xff]   ;;  %v470_v43 = vld [vmem:[%s3105_s19] sm:$0xc]  ;;  %v518_v11 = vrot.slane %v516_v0, 6  ;;  %v521_v12 = vrot.slane %v519_v1, 7  ;;  %v503_v15 = vor.u32 %v502_v5, %v499_v62 }
  0x56   : > { %2546 = vmatprep.subr.bf16.mxu1 %v2882_v44  ;;  %1079 = vmatprep.mubr.bf16.mxu0 %v2681_v26  ;;  %v2230_v47 = vrot.slane %v470_v43, 10  ;;  %v530_v7 = vld [vmem:[%s3105_s19 + $0x8] sm:$0x7]  ;;  %v539_v13 = vrot.slane %v529_v2, 7  ;;  %v2702_v17 = vld [vmem:[%s3307_s1 + $0x190] sm:$0xff]   ;;  %v512_v19 = vor.u32 %v511_v10, %v508_v6  ;;  %v2706_v23 = vld [vmem:[%s3307_s1 + $0x140] sm:$0xff]  }
  0x57   : > { %1080 = vmatmul.mubr.bf16.vlgmr.msra.gmra.mxu0 %v2679_v25  ;;  %v542_v16 = vrot.slane %v530_v7, 7  ;;  %v2704_v18 = vld [vmem:[%s3307_s1 + $0x108] sm:$0xff]   ;;  %v522_v20 = vor.u32 %v521_v12, %v518_v11  ;;  %v2707_v25 = vld [vmem:[%s3307_s1 + $0x100] sm:$0xff]   ;;  %v2714_v36 = vld [vmem:[#allocation7 + $0x38] sm:$0xff]   ;;  %vm2042_vm4 = vcmask 1043456  }
  0x58   : > { %2411 = vmatpush3.bf16.msra.mxu0 %v2686_v24  ;;  %v482_v56 = vsel %vm3177_vm12, %v2230_v47, %v481_v48  ;;  %v540_v21 = vsel %vm3225_vm1, %v2231_v9, %v539_v13  ;;  %v541_v22 = vrot.slane %v539_v13, 4  ;;  %v504_v24 = vrot.slane %v503_v15, 4  ;;  %v2721_v43 = vld [vmem:[#allocation7 + $0xb0] sm:$0xff]   ;;  %v2722_v45 = vld [vmem:[#allocation7 + $0x28] sm:$0xff]   ;;  %v2724_v47 = vld [vmem:[#allocation7 + $0x60] sm:$0xff]  }
  0x59   : > { %2412 = vmatprep.subr.bf16.mxu0 %v2688_v27  ;;  %v2684_v32 = vld [vmem:[#allocation2 + $0xc] ss:$28 sps:$4 sm:$0xff]   ;;  %488 = vst [vmem:[#allocation2 + $0x10] sm:$0xf] %v482_v56  ;;  %546 = vst [vmem:[#allocation2 + $0x18] sm:$0xf] %v540_v21 }
  0x5a   : > { %1120 = vmatprep.mubr.bf16.mxu1 %v2684_v32  ;;  %v514_v26 = vrot.slane %v512_v19, 4  ;;  %v543_v27 = vsel %vm3225_vm1, %v541_v22, %v542_v16  ;;  %v2723_v46 = vld [vmem:[#allocation7 + $0xe8] sm:$0xff]   ;;  %v2726_v49 = vld [vmem:[#allocation7 + $0x20] sm:$0xff]   ;;  %v2728_v51 = vld [vmem:[#allocation7 + $0x58] sm:$0xff]  }
  0x5b   : > { %1121 = vmatmul.mubr.bf16.vlgmr.msra.gmra.mxu1 %v2682_v31  ;;  %547 = vst [vmem:[#allocation2 + $0x34] sm:$0xf] %v543_v27  ;;  %v2708_v31 = vld [vmem:[%s3307_s1 + $0x180] sm:$0xff]   ;;  %v2727_v50 = vld [vmem:[#allocation7 + $0xe0] sm:$0xff]   ;;  %v2730_v54 = vld [vmem:[#allocation7 + $0x18] sm:$0xff]  }
  0x5c   : > { %2413 = vmatpush3.bf16.msra.mxu0 %v2689_v28  ;;  %2547 = vmatpush3.bf16.msra.mxu1 %v2687_v29  ;;  %v513_v28 = vsel %vm3232_vm2, %v504_v24, %v512_v19  ;;  %v2705_v29 = vld [vmem:[%s3307_s1 + $0x188] sm:$0xff]   ;;  %v2725_v48 = vld [vmem:[#allocation7 + $0xa8] sm:$0xff]   ;;  %v2729_v53 = vld [vmem:[#allocation7 + $0xa0] sm:$0xff]  }
  0x5d   : > { %2414 = vmatprep.subr.bf16.mxu0 %v2691_v30  ;;  %2562 = vmatprep.mubr.msk.bf16.mxu1 %vm2883_vm11, %v2882_v44  ;;  %v523_v30 = vsel %vm3232_vm2, %v514_v26, %v522_v20  ;;  %526 = vst [vmem:[#allocation2 + $0x14] sm:$0xf] %v513_v28  ;;  %v2732_v56 = vld [vmem:[#allocation7 + $0x50] sm:$0xff]   ;;  %v2733_v57 = vld [vmem:[#allocation7 + $0x98] sm:$0xff]   ;;  %v2736_v60 = vld [vmem:[#allocation7 + $0x48] sm:$0xff]  }
  0x5e   : > { %2548 = vmatprep.subr.bf16.mxu1 %v2882_v44  ;;  %527 = vst [vmem:[#allocation2 + $0x30] sm:$0xf] %v523_v30  ;;  %v2734_v58 = vld [vmem:[#allocation7 + $0x10] sm:$0xff]   ;;  %v2738_v62 = vld [vmem:[#allocation7 + $0x8] sm:$0xff]   ;;  %v2740_v0 = vld [vmem:[#allocation7 + $0x40] sm:$0xff]  }
  0x5f   : > { %v2735_v59 = vld [vmem:[#allocation7 + $0xd0] sm:$0xff]   ;;  %v2739_v63 = vld [vmem:[#allocation7 + $0xc8] sm:$0xff]   ;;  %v2742_v2 = vld [vmem:[#allocation7] sm:$0xff]  }
  0x60   : > { %2415 = vmatpush3.bf16.msra.mxu0 %v2692_v33  ;;  %2549 = vmatpush3.bf16.msra.mxu1 %v2690_v35  ;;  %v2709_v33 = vld [vmem:[#allocation2 + $0x10] ss:$28 sps:$4 sm:$0xff]   ;;  %v2741_v1 = vld [vmem:[#allocation7 + $0x88] sm:$0xff]   ;;  %v2744_v4 = vld [vmem:[#allocation7 + $0x80] sm:$0xff]  }
  0x61   : > { %2416 = vmatprep.subr.bf16.mxu0 %v2694_v34  ;;  %2550 = vmatprep.subr.bf16.mxu1 %v2882_v44  ;;  %v2713_v35 = vld [vmem:[#allocation7 + $0x78] sm:$0xff]   ;;  %v2232_v11 = vld [vmem:[%s3308_s2] ss:$0 sm:$0xff]  ;;  %v2065_v52 = vld [vmem:[#allocation11 + $0x70] sm:$0xff] }
  0x62   : > { %v2712_v32 = vld [vmem:[#allocation2 + $0x18] ss:$28 sps:$4 sm:$0xff]  }
  0x64   : > { %2417 = vmatpush3.bf16.msra.mxu0 %v2695_v37  ;;  %2551 = vmatpush3.bf16.msra.mxu1 %v2693_v39  ;;  %v2715_v37 = vld [vmem:[#allocation7 + $0xf8] sm:$0xff]  }
  0x65   : > { %2418 = vmatprep.subr.bf16.mxu0 %v2697_v38  ;;  %2552 = vmatprep.subr.bf16.mxu1 %v2882_v44  ;;  %v2711_v34 = vld [vmem:[#allocation2 + $0x14] ss:$28 sps:$4 sm:$0xff]   ;;  %v2716_v38 = vld [vmem:[#allocation7 + $0x70] sm:$0xff]  }
  0x66   : > { %1161 = vmatprep.mubr.bf16.mxu0 %v2711_v34  ;;  %v2717_v39 = vld [vmem:[#allocation7 + $0xb8] sm:$0xff]  }
  0x68   : > { %2419 = vmatpush3.bf16.msra.mxu0 %v2698_v40  ;;  %2553 = vmatpush3.bf16.msra.mxu1 %v2696_v41  ;;  %v2718_v40 = vld [vmem:[#allocation7 + $0x30] sm:$0xff]  }
  0x69   : > { %2420 = vmatprep.subr.bf16.mxu0 %v2700_v42  ;;  %2554 = vmatprep.subr.bf16.mxu1 %v2882_v44  ;;  %v2719_v41 = vld [vmem:[#allocation7 + $0xf0] sm:$0xff]   ;;  %v2720_v42 = vld [vmem:[#allocation7 + $0x68] sm:$0xff]  }
  0x6c   : > { %2421 = vmatpush3.bf16.msra.mxu0 %v2701_v55  ;;  %2555 = vmatpush3.bf16.msra.mxu1 %v2699_v61  ;;  %v2731_v55 = vld [vmem:[#allocation7 + $0xd8] sm:$0xff]   ;;  %v2737_v61 = vld [vmem:[#allocation7 + $0x90] sm:$0xff]  }
  0x6d   : > { %2422 = vmatprep.subr.bf16.mxu0 %v2703_v3  ;;  %2556 = vmatprep.subr.bf16.mxu1 %v2882_v44  ;;  %v2743_v3 = vld [vmem:[#allocation7 + $0xc0] sm:$0xff]  }
  0x70   : > { %2423 = vmatpush3.bf16.msra.mxu0 %v2704_v18  ;;  %2557 = vmatpush3.bf16.msra.mxu1 %v2702_v17 }
  0x71   : > { %2424 = vmatprep.subr.bf16.mxu0 %v2706_v23  ;;  %2558 = vmatprep.subr.bf16.mxu1 %v2882_v44 }
  0x74   : > { %2425 = vmatpush3.bf16.msra.mxu0 %v2707_v25  ;;  %2559 = vmatpush3.bf16.msra.mxu1 %v2705_v29 }
  0x75   : > { %2560 = vmatprep.subr.bf16.mxu1 %v2882_v44  ;;  %2441 = vmatprep.subr.bf16.mxu0 %v2713_v35 }
  0x77   : > { %1162 = vmatmul.mubr.bf16.vlgmr.msra.gmra.mxu0 %v2709_v33 }
  0x78   : > { %2561 = vmatpush3.bf16.msra.mxu1 %v2708_v31  ;;  %2442 = vmatpush3.bf16.msra.mxu0 %v2714_v36 }
  0x79   : > { %2463 = vmatprep.subr.bf16.mxu1 %v2715_v37  ;;  %2443 = vmatprep.subr.bf16.mxu0 %v2716_v38 }
  0x7b   : > { %2563 = vmatmul.mubr.bf16.vlgmr.msra.gmra.mxu1 %v2712_v32 }
  0x7c   : > { %2464 = vmatpush3.bf16.msra.mxu1 %v2717_v39  ;;  %2444 = vmatpush3.bf16.msra.mxu0 %v2718_v40 }
  0x7d   : > { %2465 = vmatprep.subr.bf16.mxu1 %v2719_v41  ;;  %2445 = vmatprep.subr.bf16.mxu0 %v2720_v42 }
  0x80   : > { %2466 = vmatpush3.bf16.msra.mxu1 %v2721_v43  ;;  %2446 = vmatpush3.bf16.msra.mxu0 %v2722_v45 }
  0x81   : > { %2467 = vmatprep.subr.bf16.mxu1 %v2723_v46  ;;  %2447 = vmatprep.subr.bf16.mxu0 %v2724_v47 }
  0x84   : > { %2468 = vmatpush3.bf16.msra.mxu1 %v2725_v48  ;;  %2448 = vmatpush3.bf16.msra.mxu0 %v2726_v49 }
  0x85   : > { %2469 = vmatprep.subr.bf16.mxu1 %v2727_v50  ;;  %2449 = vmatprep.subr.bf16.mxu0 %v2728_v51 }
  0x88   : > { %2470 = vmatpush3.bf16.msra.mxu1 %v2729_v53  ;;  %2450 = vmatpush3.bf16.msra.mxu0 %v2730_v54 }
  0x89   : > { %2471 = vmatprep.subr.bf16.mxu1 %v2731_v55  ;;  %2451 = vmatprep.subr.bf16.mxu0 %v2732_v56 }
  0x8c   : > { %2472 = vmatpush3.bf16.msra.mxu1 %v2733_v57  ;;  %2452 = vmatpush3.bf16.msra.mxu0 %v2734_v58 }
  0x8d   : > { %2473 = vmatprep.subr.bf16.mxu1 %v2735_v59  ;;  %2453 = vmatprep.subr.bf16.mxu0 %v2736_v60 }
  0x90   : > { %2474 = vmatpush3.bf16.msra.mxu1 %v2737_v61  ;;  %2454 = vmatpush3.bf16.msra.mxu0 %v2738_v62 }
  0x91   : > { %2475 = vmatprep.subr.bf16.mxu1 %v2739_v63  ;;  %2455 = vmatprep.subr.bf16.mxu0 %v2740_v0 }
  0x94   : > { %2476 = vmatpush3.bf16.msra.mxu1 %v2741_v1  ;;  %2456 = vmatpush3.bf16.msra.mxu0 %v2742_v2 }
  0x95   : > { %2477 = vmatprep.subr.bf16.mxu1 %v2743_v3 }
  0x98   : > { %2478 = vmatpush3.bf16.msra.mxu1 %v2744_v4 }
 0x117   : > { %v2382_v5 = vpop.f32.mrf.mxu0 }
 0x119   : > { %v2383_v7 = vpop.f32.mrf.mxu0 }
 0x11a   : > { %v2384_v10 = vadd.f32 %v2383_v7, %v2382_v5  ;;  %v2746_v7 = vld [vmem:[#allocation9 + $0x38] sm:$0xff]  }
 0x11b   : > { %v2404_v6 = vpop.f32.mrf.mxu1  ;;  %v2385_v9 = vpop.f32.mrf.mxu0 }
 0x11c   : > { %v1082_v14 = vadd.f32 %v2384_v10, %v2232_v11  ;;  %v2749_v10 = vld [vmem:[#allocation9 + $0xf8] sm:$0xff]  }
 0x11d   : > { %v2405_v8 = vpop.f32.mrf.mxu1  ;;  %v2386_v13 = vpop.f32.mrf.mxu0  ;;  %2507 = vmatprep.subr.bf16.mxu1 %v2749_v10 }
 0x11e   : > { %v2406_v15 = vadd.f32 %v2405_v8, %v2404_v6  ;;  %v2387_v16 = vadd.f32 %v2386_v13, %v2385_v9  ;;  %v2745_v6 = vld [vmem:[#allocation9 + $0x78] sm:$0xff]   ;;  %v2747_v8 = vld [vmem:[#allocation9 + $0x70] sm:$0xff]   ;;  %v2752_v13 = vld [vmem:[#allocation9 + $0x28] sm:$0xff]  }
 0x11f   : > { %v2407_v12 = vpop.f32.mrf.mxu1  ;;  %2485 = vmatprep.subr.bf16.mxu0 %v2745_v6  ;;  %v2748_v9 = vld [vmem:[#allocation9 + $0x30] sm:$0xff]  }
 0x120   : > { %v1123_v21 = vadd.f32 %v2406_v15, %v1082_v14  ;;  %v1085_v22 = vadd.f32 %v2387_v16, %v2232_v11  ;;  %v2750_v11 = vld [vmem:[#allocation9 + $0xb8] sm:$0xff]   ;;  %v2753_v14 = vld [vmem:[#allocation9 + $0xf0] sm:$0xff]   ;;  %v2755_v16 = vld [vmem:[#allocation9 + $0x60] sm:$0xff]  }
 0x121   : > { %v2408_v17 = vpop.f32.mrf.mxu1  ;;  %v2754_v15 = vld [vmem:[#allocation9 + $0xb0] sm:$0xff]  }
 0x122   : > { %v2409_v23 = vadd.f32 %v2408_v17, %v2407_v12  ;;  %v2751_v12 = vld [vmem:[#allocation9 + $0x68] sm:$0xff]   ;;  %v2756_v17 = vld [vmem:[#allocation9 + $0x20] sm:$0xff]  }
 0x124   : > { %v1126_v30 = vadd.f32 %v2409_v23, %v1085_v22  ;;  %v2760_v22 = vld [vmem:[#allocation9 + $0x18] sm:$0xff]   ;;  %v2762_v23 = vld [vmem:[#allocation9 + $0xa0] sm:$0xff]  }
 0x137   : > { %v2426_v18 = vpop.f32.mrf.mxu0 }
 0x139   : > { %v2427_v20 = vpop.f32.mrf.mxu0 }
 0x13a   : > { %v2428_v24 = vadd.f32 %v2427_v20, %v2426_v18  ;;  %v2757_v18 = vld [vmem:[#allocation9 + $0xe8] sm:$0xff]   ;;  %v2759_v20 = vld [vmem:[#allocation9 + $0x58] sm:$0xff]  }
 0x13b   : > { %v1204_v19 = vpop.f32.mrf.mxu1  ;;  %v2429_v26 = vpop.f32.mrf.mxu0 }
 0x13c   : > { %v1164_v27 = vadd.f32 %v2428_v24, %v1123_v21  ;;  %v2761_v21 = vld [vmem:[#allocation9 + $0xe0] sm:$0xff]   ;;  %v2763_v24 = vld [vmem:[#allocation9 + $0x50] sm:$0xff]  }
 0x13d   : > { %v2564_v25 = vpop.f32.mrf.mxu1  ;;  %v2430_v29 = vpop.f32.mrf.mxu0 }
 0x13e   : > { %v1205_v31 = vadd.f32 %v1204_v19, %v1164_v27  ;;  %v2431_v32 = vadd.f32 %v2430_v29, %v2429_v26  ;;  %v2758_v19 = vld [vmem:[#allocation9 + $0xa8] sm:$0xff]   ;;  %v2765_v25 = vld [vmem:[#allocation9 + $0xd8] sm:$0xff]   ;;  %v2764_v26 = vld [vmem:[#allocation9 + $0x10] sm:$0xff]  }
 0x13f   : > { %v1207_v28 = vpop.f32.mrf.mxu1  ;;  %v2766_v27 = vld [vmem:[#allocation9 + $0x98] sm:$0xff]   ;;  %v2769_v29 = vld [vmem:[#allocation9 + $0xd0] sm:$0xff]  }
 0x140   : > { %v1211_v34 = vmax.f32 %v1205_v31, 0.0  ;;  %v1167_v35 = vadd.f32 %v2431_v32, %v1126_v30  ;;  %v2768_v30 = vld [vmem:[#allocation9 + $0x8] sm:$0xff]   ;;  %v2770_v31 = vld [vmem:[#allocation9 + $0x90] sm:$0xff]   ;;  %v2771_v32 = vld [vmem:[#allocation9 + $0x40] sm:$0xff]  }
 0x141   : > { %v2565_v33 = vpop.f32.mrf.mxu1 }
 0x142   : > { %v1214_v36 = vrot.slane %v1211_v34, 1  ;;  %v1219_v37 = vrot.slane %v1211_v34, 2  ;;  %v1222_v38 = vrot.slane %v1211_v34, 3  ;;  %v1225_v39 = vrot.slane %v1211_v34, 4  ;;  %1217 = vst [vmem:[#allocation3 + $0x8] sm:$0x1] %v1211_v34 }
 0x143   : > { %v1228_v40 = vrot.slane %v1211_v34, 5  ;;  %v1231_v41 = vrot.slane %v1211_v34, 6  ;;  %v1234_v42 = vrot.slane %v1211_v34, 7  ;;  %v1208_v43 = vadd.f32 %v1207_v28, %v1167_v35  ;;  %v2767_v28 = vld [vmem:[#allocation9 + $0x48] sm:$0xff]   ;;  %v2772_v34 = vld [vmem:[#allocation9] sm:$0xff]  }
 0x144   : > { %1216 = vst [vmem:[#allocation3] sm:$0x1] %v1214_v36  ;;  %1218 = vst [vmem:[#allocation3 + $0x1] sm:$0x1] %v1214_v36  ;;  %v2773_v33 = vld [vmem:[#allocation9 + $0xc8] sm:$0xff]   ;;  %v2776_v36 = vld [vmem:[#allocation9 + $0xc0] sm:$0xff]  }
 0x145   : > { %1224 = vst [vmem:[#allocation3 + $0x2] sm:$0x1] %v1222_v38  ;;  %1221 = vst [vmem:[#allocation3 + $0x9] sm:$0x1] %v1219_v37  ;;  %v1212_v45 = vmax.f32 %v1208_v43, 0.0  ;;  %v2774_v35 = vld [vmem:[#allocation9 + $0x88] sm:$0xff]  }
 0x146   : > { %1227 = vst [vmem:[#allocation3 + $0xa] sm:$0x1] %v1225_v39  ;;  %1230 = vst [vmem:[#allocation3 + $0x3] sm:$0x1] %v1228_v40  ;;  %v2777_v37 = vld [vmem:[#allocation9 + $0x80] sm:$0xff]  }
 0x147   : > { %1236 = vst [vmem:[#allocation3 + $0x4] sm:$0x1] %v1234_v42  ;;  %1233 = vst [vmem:[#allocation3 + $0xb] sm:$0x1] %v1231_v41  ;;  %v1239_v46 = vrot.slane %v1212_v45, 1  ;;  %v1242_v47 = vrot.slane %v1212_v45, 2 }
 0x148   : > { %v1245_v48 = vrot.slane %v1212_v45, 3  ;;  %v1248_v49 = vrot.slane %v1212_v45, 4  ;;  %1237 = vst [vmem:[#allocation3 + $0xc] sm:$0x1] %v1212_v45  ;;  %v1251_v50 = vrot.slane %v1212_v45, 5  ;;  %v1254_v51 = vrot.slane %v1212_v45, 6 }
 0x149   : > { %v1257_v53 = vrot.slane %v1212_v45, 7  ;;  %1241 = vst [vmem:[#allocation3 + $0x5] sm:$0x1] %v1239_v46  ;;  %1244 = vst [vmem:[#allocation3 + $0xd] sm:$0x1] %v1242_v47 }
 0x14a   : > { %1247 = vst [vmem:[#allocation3 + $0x6] sm:$0x1] %v1245_v48  ;;  %1250 = vst [vmem:[#allocation3 + $0xe] sm:$0x1] %v1248_v49  ;;  %v2296_v39 = vld [vmem:[%s3310_s4] ss:$0 sm:$0xff] }
 0x14b   : > { %1253 = vst [vmem:[#allocation3 + $0x7] sm:$0x1] %v1251_v50  ;;  %1259 = vst [vmem:[#allocation3 + $0x10] sm:$0x1] %v1257_v53 }
 0x14c   : > { %1260 = vst [vmem:[#allocation3 + $0x18] sm:$0x1] %v1254_v51  ;;  %1256 = vst [vmem:[#allocation3 + $0xf] sm:$0x1] %v1254_v51 }
 0x152   : > { %v1261_v55 = vld [vmem:[#allocation3] sm:$0xff]  ;;  %v1266_v63 = vld [vmem:[#allocation3 + $0x10] sm:$0x1] }
 0x153   : > { %v1263_v54 = vld [vmem:[#allocation3 + $0x8] sm:$0xff]  ;;  %v1288_v58 = vpack.c.bf16 %v1261_v55, %v1261_v55  ;;  %v1276_v59 = vld [vmem:[#allocation3 + $0x18] sm:$0x1]  ;;  %v1265_v61 = vld [vmem:[#allocation3] sm:$0xfe]  ;;  %v1271_v1 = vrot.slane %v1266_v63, 1 }
 0x154   : > { %v1275_v56 = vld [vmem:[#allocation3 + $0x8] sm:$0xfe]  ;;  %v1289_v57 = vpack.c.bf16 %v1263_v54, %v1263_v54  ;;  %v1280_v62 = vrot.slane %v1276_v59, 1  ;;  %v1270_v0 = vrot.slane %v1265_v61, 1 }
 0x155   : > { %v1279_v60 = vrot.slane %v1275_v56, 1 }
 0x156   : > { %1587 = vmatprep.mubr.bf16.mxu0 %v1289_v57  ;;  %v1272_v4 = vsel %vm1269_vm3, %v1270_v0, %v1271_v1 }
 0x157   : > { %1588 = vmatmul.mubr.bf16.vlgmr.msra.gmra.mxu0 %v1288_v58  ;;  %v1281_v2 = vsel %vm1269_vm3, %v1279_v60, %v1280_v62  ;;  %v1290_v5 = vpack.c.bf16 %v1272_v4, %v1272_v4 }
 0x158   : > { %v1291_v3 = vpack.c.bf16 %v1281_v2, %v1281_v2  ;;  %2486 = vmatpush3.bf16.msra.mxu0 %v2746_v7 }
 0x159   : > { %2487 = vmatprep.subr.bf16.mxu0 %v2747_v8 }
 0x15a   : > { %1627 = vmatprep.mubr.bf16.mxu1 %v1291_v3 }
 0x15b   : > { %1628 = vmatmul.mubr.bf16.vlgmr.msra.gmra.mxu1 %v1290_v5 }
 0x15c   : > { %2488 = vmatpush3.bf16.msra.mxu0 %v2748_v9  ;;  %2508 = vmatpush3.bf16.msra.mxu1 %v2750_v11 }
 0x15d   : > { %2489 = vmatprep.subr.bf16.mxu0 %v2751_v12  ;;  %2509 = vmatprep.subr.bf16.mxu1 %v2753_v14 }
 0x160   : > { %2490 = vmatpush3.bf16.msra.mxu0 %v2752_v13  ;;  %2510 = vmatpush3.bf16.msra.mxu1 %v2754_v15  ;;  %v2066_v13 = vld [vmem:[#allocation11 + $0x78] sm:$0xff] }
 0x161   : > { %2491 = vmatprep.subr.bf16.mxu0 %v2755_v16  ;;  %2511 = vmatprep.subr.bf16.mxu1 %v2757_v18  ;;  %v2064_v18 = vld [vmem:[#allocation11 + $0x68] sm:$0xff] }
 0x164   : > { %2492 = vmatpush3.bf16.msra.mxu0 %v2756_v17  ;;  %2512 = vmatpush3.bf16.msra.mxu1 %v2758_v19  ;;  %v2063_v19 = vld [vmem:[#allocation11 + $0x60] sm:$0xff] }
 0x165   : > { %2493 = vmatprep.subr.bf16.mxu0 %v2759_v20  ;;  %2513 = vmatprep.subr.bf16.mxu1 %v2761_v21  ;;  %v2062_v20 = vld [vmem:[#allocation11 + $0x58] sm:$0xff]  ;;  %v2061_v21 = vld [vmem:[#allocation11 + $0x50] sm:$0xff] }
 0x168   : > { %2494 = vmatpush3.bf16.msra.mxu0 %v2760_v22  ;;  %2514 = vmatpush3.bf16.msra.mxu1 %v2762_v23  ;;  %v2060_v22 = vld [vmem:[#allocation11 + $0x48] sm:$0xff]  ;;  %v2059_v23 = vld [vmem:[#allocation11 + $0x40] sm:$0xff] }
 0x169   : > { %2495 = vmatprep.subr.bf16.mxu0 %v2763_v24  ;;  %2515 = vmatprep.subr.bf16.mxu1 %v2765_v25  ;;  %v2058_v24 = vld [vmem:[#allocation11 + $0x38] sm:$0xff]  ;;  %v2057_v25 = vld [vmem:[#allocation11 + $0x30] sm:$0xff] }
 0x16c   : > { %2496 = vmatpush3.bf16.msra.mxu0 %v2764_v26  ;;  %2516 = vmatpush3.bf16.msra.mxu1 %v2766_v27  ;;  %v2056_v26 = vld [vmem:[#allocation11 + $0x28] sm:$0xff]  ;;  %v2055_v27 = vld [vmem:[#allocation11 + $0x20] sm:$0xff] }
 0x16d   : > { %2497 = vmatprep.subr.bf16.mxu0 %v2767_v28  ;;  %2517 = vmatprep.subr.bf16.mxu1 %v2769_v29  ;;  %v2054_v28 = vld [vmem:[#allocation11 + $0x18] sm:$0xff]  ;;  %v2053_v29 = vld [vmem:[#allocation11 + $0x10] sm:$0xff] }
 0x170   : > { %2498 = vmatpush3.bf16.msra.mxu0 %v2768_v30  ;;  %2518 = vmatpush3.bf16.msra.mxu1 %v2770_v31  ;;  %v2052_v30 = vld [vmem:[#allocation11 + $0x8] sm:$0xff]  ;;  %v2051_v31 = vld [vmem:[#allocation11] sm:$0xff] }
 0x171   : > { %2499 = vmatprep.subr.bf16.mxu0 %v2771_v32  ;;  %2519 = vmatprep.subr.bf16.mxu1 %v2773_v33 }
 0x174   : > { %2500 = vmatpush3.bf16.msra.mxu0 %v2772_v34  ;;  %2520 = vmatpush3.bf16.msra.mxu1 %v2774_v35 }
 0x175   : > { %2566 = vmatprep.subr.mxu0 %v2882_v44  ;;  %2521 = vmatprep.subr.bf16.mxu1 %v2776_v36  ;;  %v2331_v36 = vld [vmem:[%s3312_s6] ss:$0 sm:$0xff] }
 0x178   : > { %2522 = vmatpush3.bf16.msra.mxu1 %v2777_v37 }
 0x217   : > { %v2457_v38 = vpop.f32.mrf.mxu0 }
 0x219   : > { %v2458_v40 = vpop.f32.mrf.mxu0 }
 0x21a   : > { %v2459_v41 = vadd.f32 %v2458_v40, %v2457_v38 }
 0x21b   : > { %v2479_v42 = vpop.f32.mrf.mxu1  ;;  %v2460_v43 = vpop.f32.mrf.mxu0 }
 0x21c   : > { %v1590_v45 = vadd.f32 %v2459_v41, %v2296_v39 }
 0x21d   : > { %v2480_v46 = vpop.f32.mrf.mxu1  ;;  %v2461_v47 = vpop.f32.mrf.mxu0 }
 0x21e   : > { %v2481_v48 = vadd.f32 %v2480_v46, %v2479_v42 }
 0x21f   : > { %v2482_v49 = vpop.f32.mrf.mxu1 }
 0x220   : > { %v1630_v50 = vadd.f32 %v2481_v48, %v1590_v45 }
 0x221   : > { %v2483_v51 = vpop.f32.mrf.mxu1 }
 0x222   : > { %v1635_v53 = vmax.f32 %v1630_v50, 0.0 }
 0x224   : > { %v1637_v54 = vrot.slane %v1635_v53, 1  ;;  %1640 = vst [vmem:[#allocation5 + $0x8] sm:$0x1] %v1635_v53  ;;  %v1642_v55 = vrot.slane %v1635_v53, 2  ;;  %v1645_v56 = vrot.slane %v1635_v53, 3  ;;  %v1648_v57 = vrot.slane %v1635_v53, 4 }
 0x225   : > { %v1651_v58 = vrot.slane %v1635_v53, 5  ;;  %v1654_v59 = vrot.slane %v1635_v53, 6  ;;  %v1657_v60 = vrot.slane %v1635_v53, 7 }
 0x226   : > { %1639 = vst [vmem:[#allocation5] sm:$0x1] %v1637_v54  ;;  %1641 = vst [vmem:[#allocation5 + $0x1] sm:$0x1] %v1637_v54 }
 0x227   : > { %1644 = vst [vmem:[#allocation5 + $0x9] sm:$0x1] %v1642_v55  ;;  %1647 = vst [vmem:[#allocation5 + $0x2] sm:$0x1] %v1645_v56  ;;  %v2067_v55 = vld [vmem:[%s3314_s8] sm:$0x1] }
 0x228   : > { %1650 = vst [vmem:[#allocation5 + $0xa] sm:$0x1] %v1648_v57  ;;  %1653 = vst [vmem:[#allocation5 + $0x3] sm:$0x1] %v1651_v58 }
 0x229   : > { %1656 = vst [vmem:[#allocation5 + $0xb] sm:$0x1] %v1654_v59  ;;  %1659 = vst [vmem:[#allocation5 + $0x4] sm:$0x1] %v1657_v60 }
 0x22a   : > { %1660 = vst [vmem:[#allocation5 + $0xc] sm:$0x1] %v1654_v59 }
 0x22f   : > { %v1661_v61 = vld [vmem:[#allocation5] sm:$0xf] }
 0x230   : > { %v1663_v62 = vld [vmem:[#allocation5 + $0x8] sm:$0xf]  ;;  %v1665_v63 = vld [vmem:[#allocation5] sm:$0x1e]  ;;  %1662 = vst [vmem:[#allocation6] sm:$0xf] %v1661_v61 }
 0x231   : > { %1664 = vst [vmem:[#allocation6 + $0x4] sm:$0xf] %v1663_v62  ;;  %v1667_v0 = vcombine.high %v1665_v63, %v1665_v63  ;;  %v1677_v1 = vld [vmem:[#allocation5 + $0x8] sm:$0x1e]  ;;  %v2329_v3 = vrot.slane %v1665_v63, 9 }
 0x232   : > { %v1679_v2 = vcombine.high %v1677_v1, %v1677_v1  ;;  %v2330_v5 = vrot.slane %v1677_v1, 9 }
 0x233   : > { %v1673_v4 = vrot.slane %v1667_v0, 5 }
 0x234   : > { %v1682_v6 = vrot.slane %v1679_v2, 5 }
 0x235   : > { %v1674_v7 = vsel %vm3127_vm6, %v2329_v3, %v1673_v4 }
 0x236   : > { %1676 = vst [vmem:[#allocation6 + $0x8] sm:$0xf] %v1674_v7  ;;  %v1683_v8 = vsel %vm3127_vm6, %v2330_v5, %v1682_v6 }
 0x237   : > { %1685 = vst [vmem:[#allocation6 + $0xc] sm:$0xf] %v1683_v8 }
 0x238   : > { %v1686_v9 = vld [vmem:[#allocation6] sm:$0xff] }
 0x239   : > { %v1690_v10 = vcombine.high %v1686_v9, %v1686_v9  ;;  %v1694_v12 = vpack.c.bf16 %v1686_v9, %v1686_v9 }
 0x23b   : > { %v1695_v11 = vpack.c.bf16 %v1690_v10, %v1690_v10 }
 0x23d   : > { %1993 = vmatprep.mubr.bf16.mxu0 %v1695_v11 }
 0x23e   : > { %1994 = vmatmul.mubr.bf16.vlgmr.msra.gmra.mxu0 %v1694_v12  ;;  %v1687_v14 = vld [vmem:[#allocation6 + $0x8] sm:$0xff] }
 0x23f   : > { %v1691_v15 = vcombine.high %v1687_v14, %v1687_v14  ;;  %2567 = vmatpush3.msra.mxu0 %v2066_v13  ;;  %2598 = vmatprep.mubr.msk.f32.mxu0 %vm2883_vm11, %v2882_v44  ;;  %v1696_v17 = vpack.c.bf16 %v1687_v14, %v1687_v14 }
 0x240   : > { %2568 = vmatprep.subr.mxu0 %v2882_v44 }
 0x241   : > { %v1697_v16 = vpack.c.bf16 %v1691_v15, %v1691_v15  ;;  %2569 = vmatpush3.msra.mxu0 %v2065_v52 }
 0x242   : > { %2570 = vmatprep.subr.mxu0 %v2882_v44 }
 0x243   : > { %2033 = vmatprep.mubr.bf16.mxu1 %v1697_v16  ;;  %2571 = vmatpush3.msra.mxu0 %v2064_v18 }
 0x244   : > { %2034 = vmatmul.mubr.bf16.vlgmr.msra.gmra.mxu1 %v1696_v17  ;;  %2572 = vmatprep.subr.mxu0 %v2882_v44 }
 0x245   : > { %2573 = vmatpush3.msra.mxu0 %v2063_v19 }
 0x246   : > { %2574 = vmatprep.subr.mxu0 %v2882_v44 }
 0x247   : > { %2575 = vmatpush3.msra.mxu0 %v2062_v20 }
 0x248   : > { %2576 = vmatprep.subr.mxu0 %v2882_v44 }
 0x249   : > { %2577 = vmatpush3.msra.mxu0 %v2061_v21 }
 0x24a   : > { %2578 = vmatprep.subr.mxu0 %v2882_v44 }
 0x24b   : > { %2579 = vmatpush3.msra.mxu0 %v2060_v22 }
 0x24c   : > { %2580 = vmatprep.subr.mxu0 %v2882_v44 }
 0x24d   : > { %2581 = vmatpush3.msra.mxu0 %v2059_v23 }
 0x24e   : > { %2582 = vmatprep.subr.mxu0 %v2882_v44 }
 0x24f   : > { %2583 = vmatpush3.msra.mxu0 %v2058_v24 }
 0x250   : > { %2584 = vmatprep.subr.mxu0 %v2882_v44 }
 0x251   : > { %2585 = vmatpush3.msra.mxu0 %v2057_v25 }
 0x252   : > { %2586 = vmatprep.subr.mxu0 %v2882_v44 }
 0x253   : > { %2587 = vmatpush3.msra.mxu0 %v2056_v26 }
 0x254   : > { %2588 = vmatprep.subr.mxu0 %v2882_v44 }
 0x255   : > { %2589 = vmatpush3.msra.mxu0 %v2055_v27 }
 0x256   : > { %2590 = vmatprep.subr.mxu0 %v2882_v44 }
 0x257   : > { %2591 = vmatpush3.msra.mxu0 %v2054_v28 }
 0x258   : > { %2592 = vmatprep.subr.mxu0 %v2882_v44 }
 0x259   : > { %2593 = vmatpush3.msra.mxu0 %v2053_v29 }
 0x25a   : > { %2594 = vmatprep.subr.mxu0 %v2882_v44 }
 0x25b   : > { %2595 = vmatpush3.msra.mxu0 %v2052_v30 }
 0x25c   : > { %2596 = vmatprep.subr.mxu0 %v2882_v44 }
 0x25d   : > { %2597 = vmatpush3.msra.mxu0 %v2051_v31 }
 0x2fe   : > { %v2501_v32 = vpop.f32.mrf.mxu0 }
 0x300   : > { %v2502_v33 = vpop.f32.mrf.mxu0 }
 0x301   : > { %v2503_v35 = vadd.f32 %v2502_v33, %v2501_v32 }
 0x302   : > { %v2504_v34 = vpop.f32.mrf.mxu0 }
 0x303   : > { %v1996_v40 = vadd.f32 %v2503_v35, %v2331_v36 }
 0x304   : > { %v2523_v37 = vpop.f32.mrf.mxu1  ;;  %v2505_v38 = vpop.f32.mrf.mxu0 }
 0x306   : > { %v2524_v39 = vpop.f32.mrf.mxu1 }
 0x307   : > { %v2525_v41 = vadd.f32 %v2524_v39, %v2523_v37 }
 0x308   : > { %v2526_v42 = vpop.f32.mrf.mxu1 }
 0x309   : > { %v2036_v43 = vadd.f32 %v2525_v41, %v1996_v40 }
 0x30a   : > { %v2527_v45 = vpop.f32.mrf.mxu1 }
 0x30b   : > { %v2041_v44 = vmax.f32 %v2036_v43, 0.0 }
 0x30d   : > { %v2043_v46 = vsel %vm2042_vm4, %v2041_v44, 0.0 }
 0x30e   : > { %v2044_v47 = vrot.slane %v2043_v46, 4 }
 0x310   : > { %v2045_v48 = vadd.f32 %v2044_v47, %v2043_v46 }
 0x312   : > { %v2046_v49 = vrot.slane %v2045_v48, 2 }
 0x314   : > { %v2047_v50 = vadd.f32 %v2046_v49, %v2045_v48 }
 0x316   : > { %v2048_v51 = vrot.slane %v2047_v50, 1 }
 0x318   : > { %v2049_v53 = vadd.f32 %v2048_v51, %v2047_v50 }
 0x31a   : > { %v2050_v54 = vmul.f32 0.0625, %v2049_v53 }
 0x31c   : > { %2599 = vmatmul.mubr.f32.vlgmr.msra.gmra.mxu0 %v2050_v54 }
 0x3dc   : > { %v2134_v56 = vpop.f32.mrf.mxu0 }
 0x3dd   : > { %v2135_v57 = vadd.f32 %v2134_v56, %v2067_v55 }
 0x3de   : > { %v2600_v58 = vpop.f32.mrf.mxu0 }
 0x3df   : > { %2138 = vst [vmem:[%s372_s26] sm:$0x1] %v2135_v57 }
 0x3e0 PF: > { %s21_s30 = sadd.s32 1, %s2873_s30  }
 0x3e1   : > { %p18_p3 = scmp.ge.s32.totalorder %s21_s30, 4  }
 0x3e3   :  { %20 = sbr.rel (!%p18_p3) target bundleno = 2 (0x2), region = 99 }
 0x3e8   :  { %2156 = vsyncpa [#allocation8], 1 }
 0x3e9   :  { %2158 = vsyncpa [#allocation8 + $0x1], 1 }
 0x3ea   :  { %2159 = vsyncpa [#allocation10], 1 }

</bundles_post_ra>
